<compile_context>
chip_gen: v5e
topology: v5e:2x2
jax: 0.10.0
libtpu: 0.0.40
codegen_flags: <defaults>
</compile_context>

<pallas_src>
import functools
import math

import jax
import jax.numpy as jnp
from jax.experimental import pallas as pl
from jax.experimental.pallas import tpu as pltpu

LANE = 128            # lane width: hidden/class dims padded to this
NEG_INF = -1e30       # bias for padded class columns (exp underflows to 0)
FUSED_MAX_NODES = 2048  # int8 A resident in VMEM: <= 4 MiB, fits all generations


def _round_up(x, m):
    return (x + m - 1) // m * m


# ----------------------------- kernels ------------------------------------- #

def _conv_kernel(a_ref, p_ref, w_ref, b_ref, out_ref, acc_ref, *, activation):
    """One GCNGhostConv layer, K-tiled:
         acc += A_tile(int8->bf16) @ P_ktile          (f32 accumulate)
       on the last K step:
         Z = acc(bf16) @ W + b ; activation ; lane-dense store.
    """
    k = pl.program_id(1)

    @pl.when(k == 0)
    def _init():
        acc_ref[...] = jnp.zeros_like(acc_ref)

    a = a_ref[...].astype(jnp.bfloat16)        # int8 edge counts -> bf16 (exact)
    acc_ref[...] += jnp.dot(a, p_ref[...], preferred_element_type=jnp.float32)

    @pl.when(k == pl.num_programs(1) - 1)
    def _finalize():
        z = jnp.dot(acc_ref[...].astype(jnp.bfloat16), w_ref[...],
                    preferred_element_type=jnp.float32) + b_ref[...]
        if activation == "relu":
            # dropout: identity (eval mode)
            out_ref[...] = jnp.maximum(z, 0.0).astype(out_ref.dtype)
        else:  # "log_softmax"  (padded class cols carry -1e30 bias -> masked)
            m = jnp.max(z, axis=1, keepdims=True)
            zs = z - m
            lse = jnp.log(jnp.sum(jnp.exp(zs), axis=1, keepdims=True))
            out_ref[...] = (zs - lse).astype(out_ref.dtype)


def _gcn_fused_kernel(a_ref, x_ref, w1_ref, b1_ref, w2_ref, b2_ref, out_ref):
    """Small-graph path: A resident in VMEM, both layers in one kernel."""
    a = a_ref[...].astype(jnp.bfloat16)
    ax = jnp.dot(a, x_ref[...], preferred_element_type=jnp.float32)
    h = jnp.dot(ax.astype(jnp.bfloat16), w1_ref[...],
                preferred_element_type=jnp.float32) + b1_ref[...]
    h = jnp.maximum(h, 0.0).astype(jnp.bfloat16)     # dropout: identity (eval)
    ah = jnp.dot(a, h, preferred_element_type=jnp.float32)
    z = jnp.dot(ah.astype(jnp.bfloat16), w2_ref[...],
                preferred_element_type=jnp.float32) + b2_ref[...]
    m = jnp.max(z, axis=1, keepdims=True)
    zs = z - m
    out_ref[...] = zs - jnp.log(jnp.sum(jnp.exp(zs), axis=1, keepdims=True))


# ----------------------------- wrappers ------------------------------------- #

def build_dense_adjacency(edge_index, num_nodes):
    """Dense [N_dst, N_src] edge-count matrix as int8 (exact for counts <= 127).
    PyG default flow is source_to_target: edge_index[0]=src(j), edge_index[1]=dst(i)."""
    src, dst = edge_index[0], edge_index[1]
    adj = jnp.zeros((num_nodes, num_nodes), jnp.int32).at[dst, src].add(1)
    max_mult = int(jnp.max(adj))
    assert max_mult <= 127, f"edge multiplicity {max_mult} exceeds int8 range"
    return adj.astype(jnp.int8)


def prepare_gcn(adj_i8, x, w1, b1, w2, b2, *, row_tile=256, k_tile=512,
                use_fused=None):
    """One-time preparation (hoisted out of the forward path): pads node /
    hidden / class dims and casts operands to their kernel dtypes so that
    per-forward HBM traffic is only the kernel DMAs."""
    n = adj_i8.shape[0]
    f = x.shape[1]
    hdim = w1.shape[1]
    c = w2.shape[1]
    h_pad = _round_up(hdim, LANE)
    c_pad = _round_up(c, LANE)

    if use_fused is None:
        use_fused = n <= FUSED_MAX_NODES

    if use_fused:
        tm = tk = n_pad = n
    else:
        tm, tk = row_tile, k_tile
        n_pad = _round_up(n, math.lcm(tm, tk))

    adj_p = jnp.zeros((n_pad, n_pad), jnp.int8).at[:n, :n].set(adj_i8)
    x_p = jnp.zeros((n_pad, f), jnp.bfloat16).at[:n, :].set(x.astype(jnp.bfloat16))
    w1_p = jnp.zeros((f, h_pad), jnp.bfloat16).at[:, :hdim].set(w1.astype(jnp.bfloat16))
    b1_p = jnp.zeros((1, h_pad), jnp.float32).at[0, :hdim].set(b1.astype(jnp.float32))
    # Zero rows beyond hdim kill H1's padded lanes; -1e30 bias removes padded
    # class columns from max / sum-exp in log_softmax.
    w2_p = jnp.zeros((h_pad, c_pad), jnp.bfloat16).at[:hdim, :c].set(w2.astype(jnp.bfloat16))
    b2_p = jnp.full((1, c_pad), NEG_INF, jnp.float32).at[0, :c].set(b2.astype(jnp.float32))

    return dict(adj=adj_p, x=x_p, w1=w1_p, b1=b1_p, w2=w2_p, b2=b2_p,
                n=n, c=c, f=f, n_pad=n_pad, h_pad=h_pad, c_pad=c_pad,
                tm=tm, tk=tk, fused=use_fused)


def _tiled_conv(adj, p, w, b, *, out_dtype, activation, tm, tk, cost):
    n_pad = adj.shape[0]
    kdim = p.shape[1]       # width of the propagated operand (F or H_pad)
    odim = w.shape[1]       # padded output width (H_pad or C_pad)
    wrows = w.shape[0]
    grid = (n_pad // tm, n_pad // tk)
    kernel = functools.partial(_conv_kernel, activation=activation)
    return pl.pallas_call(
        kernel,
        out_shape=jax.ShapeDtypeStruct((n_pad, odim), out_dtype),
        grid=grid,
        in_specs=[
            pl.BlockSpec((tm, tk), lambda i, k: (i, k)),        # A int8 tile (streamed)
            pl.BlockSpec((tk, kdim), lambda i, k: (k, 0)),      # X / H1 k-tile
            pl.BlockSpec((wrows, odim), lambda i, k: (0, 0)),   # W (resident)
            pl.BlockSpec((1, odim), lambda i, k: (0, 0)),       # bias (resident)
        ],
        out_specs=pl.BlockSpec((tm, odim), lambda i, k: (i, 0)),
        scratch_shapes=[pltpu.VMEM((tm, kdim), jnp.float32)],   # f32 accumulator
        compiler_params=pltpu.CompilerParams(
            dimension_semantics=("parallel", "arbitrary")),
        cost_estimate=cost,
    )(adj, p, w, b)


def _gcn_tiled(prep):
    n_pad, f = prep["n_pad"], prep["f"]
    h_pad, c_pad = prep["h_pad"], prep["c_pad"]
    tm, tk = prep["tm"], prep["tk"]
    adj = prep["adj"]
    n_row_tiles = n_pad // tm

    cost1 = pl.CostEstimate(
        flops=int(2 * n_pad * n_pad * f + 2 * n_pad * f * h_pad),
        transcendentals=0,
        bytes_accessed=int(n_pad * n_pad + n_row_tiles * n_pad * f * 2
                           + n_pad * h_pad * 2),
    )
    h1 = _tiled_conv(adj, prep["x"], prep["w1"], prep["b1"],
                     out_dtype=jnp.bfloat16, activation="relu",
                     tm=tm, tk=tk, cost=cost1)

    cost2 = pl.CostEstimate(
        flops=int(2 * n_pad * n_pad * h_pad + 2 * n_pad * h_pad * c_pad),
        transcendentals=int(n_pad * c_pad),
        bytes_accessed=int(n_pad * n_pad + n_row_tiles * n_pad * h_pad * 2
                           + n_pad * c_pad * 4),
    )
    return _tiled_conv(adj, h1, prep["w2"], prep["b2"],
                       out_dtype=jnp.float32, activation="log_softmax",
                       tm=tm, tk=tk, cost=cost2)


def _gcn_fused(prep):
    n_pad, f = prep["n_pad"], prep["f"]
    h_pad, c_pad = prep["h_pad"], prep["c_pad"]
    cost = pl.CostEstimate(
        flops=int(2 * n_pad * n_pad * (f + h_pad)
                  + 2 * n_pad * (f * h_pad + h_pad * c_pad)),
        transcendentals=int(n_pad * c_pad),
        bytes_accessed=int(n_pad * n_pad + n_pad * f * 2 + n_pad * c_pad * 4
                           + f * h_pad * 2 + h_pad * c_pad * 2),
    )
    return pl.pallas_call(
        _gcn_fused_kernel,
        out_shape=jax.ShapeDtypeStruct((n_pad, c_pad), jnp.float32),
        cost_estimate=cost,
    )(prep["adj"], prep["x"], prep["w1"], prep["b1"], prep["w2"], prep["b2"])


def gcn_forward(prep):
    """Full GCN forward on the prepared operands; returns (N, num_classes) log-probs."""
    out_pad = _gcn_fused(prep) if prep["fused"] else _gcn_tiled(prep)
    return out_pad[: prep["n"], : prep["c"]]


# ----------------------------- references ----------------------------------- #

def xavier_uniform(key, fan_in, fan_out):
    bound = jnp.sqrt(6.0 / (fan_in + fan_out))
    return jax.random.uniform(key, (fan_in, fan_out), dtype=jnp.float32,
                              minval=-bound, maxval=bound)


def reference_forward_mixed(adj_i8, x, w1, b1, w2, b2):
    """Pure-JAX reference mirroring the kernels' bf16/f32 precision policy."""
    bf16 = jnp.bfloat16
    a = adj_i8.astype(jnp.float32).astype(bf16)     # exact: counts <= 127
    ax = jnp.dot(a, x.astype(bf16), preferred_element_type=jnp.float32)
    h = jnp.dot(ax.astype(bf16), w1.astype(bf16),
                preferred_element_type=jnp.float32) + b1.reshape(1, -1)
    h = jnp.maximum(h, 0.0).astype(bf16)
    ah = jnp.dot(a, h, preferred_element_type=jnp.float32)
    z = jnp.dot(ah.astype(bf16), w2.astype(bf16),
                preferred_element_type=jnp.float32) + b2.reshape(1, -1)
    return jax.nn.log_softmax(z, axis=1)


def reference_forward_f32(adj_i8, x, w1, b1, w2, b2):
    """Full-f32 reference (matches the PyTorch module's math exactly)."""
    a = adj_i8.astype(jnp.float32)
    h = jnp.maximum(a @ (x @ w1) + b1, 0.0)
    z = a @ (h @ w2) + b2
    return jax.nn.log_softmax(z, axis=1)


# ----------------------------- demo ----------------------------------------- #

if __name__ == "__main__":
    # Small synthetic "cora-like" graph.
    num_nodes = 256
    num_features = 16
    hidden_channels = 32
    num_classes = 8
    num_edges = 1024

    key = jax.random.PRNGKey(0)
    k_x, k_src, k_dst, k_w1, k_w2 = jax.random.split(key, 5)

    x = jax.random.normal(k_x, (num_nodes, num_features), dtype=jnp.float32)
    src = jax.random.randint(k_src, (num_edges,), 0, num_nodes)
    dst = jax.random.randint(k_dst, (num_edges,), 0, num_nodes)
    edge_index = jnp.stack([src, dst], axis=0)  # [2, E]

    adj_i8 = build_dense_adjacency(edge_index, num_nodes)

    # Deterministic parameter init matching the module's reset_parameters().
    w1 = xavier_uniform(k_w1, num_features, hidden_channels)
    b1 = jnp.zeros((hidden_channels,), dtype=jnp.float32)
    w2 = xavier_uniform(k_w2, hidden_channels, num_classes)
    b2 = jnp.zeros((num_classes,), dtype=jnp.float32)

    ref_mixed = reference_forward_mixed(adj_i8, x, w1, b1, w2, b2)
    ref_f32 = reference_forward_f32(adj_i8, x, w1, b1, w2, b2)

    # Path 1: fused small-graph kernel (auto-selected for N=256).
    prep_fused = prepare_gcn(adj_i8, x, w1, b1, w2, b2)
    assert prep_fused["fused"]
    out_fused = jax.block_until_ready(gcn_forward(prep_fused))
    assert out_fused.shape == (num_nodes, num_classes)

    # Path 2: K-tiled streaming kernels (forced, small tiles for the demo size).
    prep_tiled = prepare_gcn(adj_i8, x, w1, b1, w2, b2,
                             row_tile=128, k_tile=128, use_fused=False)
    out_tiled = jax.block_until_ready(gcn_forward(prep_tiled))
    assert out_tiled.shape == (num_nodes, num_classes)

    for name, out in (("fused", out_fused), ("tiled", out_tiled)):
        # Tight check vs. reference with the identical bf16/f32 precision policy.
        err = float(jnp.max(jnp.abs(out - ref_mixed)))
        assert jnp.allclose(out, ref_mixed, atol=1e-3, rtol=1e-3), (name, err)
        # Loose semantic sanity check vs. full-f32 math (bf16 MXU inputs add noise).
        err32 = float(jnp.max(jnp.abs(out - ref_f32)))
        assert jnp.allclose(out, ref_f32, atol=0.5, rtol=0.1), (name, err32)

    print("KERNEL_OK")
</pallas_src>

<mosaic_0001>
module attributes {stable_mosaic.version = 11 : i64} {
  func.func @_gcn_fused_kernel(%arg0: memref<256x256xi8, #tpu.memory_space<vmem>>, %arg1: memref<256x16xbf16, #tpu.memory_space<vmem>>, %arg2: memref<16x128xbf16, #tpu.memory_space<vmem>>, %arg3: memref<1x128xf32, #tpu.memory_space<vmem>>, %arg4: memref<128x128xbf16, #tpu.memory_space<vmem>>, %arg5: memref<1x128xf32, #tpu.memory_space<vmem>>, %arg6: memref<256x128xf32, #tpu.memory_space<vmem>>) attributes {dimension_semantics = [], scalar_prefetch = 0 : i64, scratch_operands = 0 : i64, tpu.core_type = #tpu.core_type<tc>} {
    %c0 = arith.constant 0 : index
    %c0_0 = arith.constant 0 : index
    %0 = vector.load %arg0[%c0, %c0_0] : memref<256x256xi8, #tpu.memory_space<vmem>>, vector<256x256xi8>
    %1 = arith.sitofp %0 : vector<256x256xi8> to vector<256x256xbf16>
    %c0_1 = arith.constant 0 : index
    %c0_2 = arith.constant 0 : index
    %2 = vector.load %arg1[%c0_1, %c0_2] : memref<256x16xbf16, #tpu.memory_space<vmem>>, vector<256x16xbf16>
    %cst = arith.constant dense<0.000000e+00> : vector<256x16xf32>
    %3 = tpu.matmul %1, %2, %cst {dimension_numbers = #tpu.dot_dimension_numbers<[1], [0], [0], [1], [0, 0, 1, 1], [], []>} : vector<256x256xbf16>, vector<256x16xbf16>, vector<256x16xf32> -> vector<256x16xf32>
    %4 = arith.truncf %3 : vector<256x16xf32> to vector<256x16xbf16>
    %c0_3 = arith.constant 0 : index
    %c0_4 = arith.constant 0 : index
    %5 = vector.load %arg2[%c0_3, %c0_4] : memref<16x128xbf16, #tpu.memory_space<vmem>>, vector<16x128xbf16>
    %cst_5 = arith.constant dense<0.000000e+00> : vector<256x128xf32>
    %6 = tpu.matmul %4, %5, %cst_5 {dimension_numbers = #tpu.dot_dimension_numbers<[1], [0], [0], [1], [0, 0, 1, 1], [], []>} : vector<256x16xbf16>, vector<16x128xbf16>, vector<256x128xf32> -> vector<256x128xf32>
    %c0_6 = arith.constant 0 : index
    %c0_7 = arith.constant 0 : index
    %7 = vector.load %arg3[%c0_6, %c0_7] : memref<1x128xf32, #tpu.memory_space<vmem>>, vector<1x128xf32>
    %8 = vector.broadcast %7 : vector<1x128xf32> to vector<256x128xf32>
    %9 = arith.addf %6, %8 : vector<256x128xf32>
    %cst_8 = arith.constant 0.000000e+00 : f32
    %10 = vector.broadcast %cst_8 : f32 to vector<256x128xf32>
    %11 = arith.maximumf %9, %10 : vector<256x128xf32>
    %12 = arith.truncf %11 : vector<256x128xf32> to vector<256x128xbf16>
    %cst_9 = arith.constant dense<0.000000e+00> : vector<256x128xf32>
    %13 = tpu.matmul %1, %12, %cst_9 {dimension_numbers = #tpu.dot_dimension_numbers<[1], [0], [0], [1], [0, 0, 1, 1], [], []>} : vector<256x256xbf16>, vector<256x128xbf16>, vector<256x128xf32> -> vector<256x128xf32>
    %14 = arith.truncf %13 : vector<256x128xf32> to vector<256x128xbf16>
    %c0_10 = arith.constant 0 : index
    %c0_11 = arith.constant 0 : index
    %15 = vector.load %arg4[%c0_10, %c0_11] : memref<128x128xbf16, #tpu.memory_space<vmem>>, vector<128x128xbf16>
    %cst_12 = arith.constant dense<0.000000e+00> : vector<256x128xf32>
    %16 = tpu.matmul %14, %15, %cst_12 {dimension_numbers = #tpu.dot_dimension_numbers<[1], [0], [0], [1], [0, 0, 1, 1], [], []>} : vector<256x128xbf16>, vector<128x128xbf16>, vector<256x128xf32> -> vector<256x128xf32>
    %c0_13 = arith.constant 0 : index
    %c0_14 = arith.constant 0 : index
    %17 = vector.load %arg5[%c0_13, %c0_14] : memref<1x128xf32, #tpu.memory_space<vmem>>, vector<1x128xf32>
    %18 = vector.broadcast %17 : vector<1x128xf32> to vector<256x128xf32>
    %19 = arith.addf %16, %18 : vector<256x128xf32>
    %cst_15 = arith.constant dense<0xFF800000> : vector<256xf32>
    %20 = vector.multi_reduction <maximumf>, %19, %cst_15 [1] : vector<256x128xf32> to vector<256xf32>
    %21 = vector.shape_cast %20 : vector<256xf32> to vector<256x1xf32>
    %22 = vector.broadcast %21 : vector<256x1xf32> to vector<256x128xf32>
    %23 = arith.subf %19, %22 : vector<256x128xf32>
    %24 = math.exp %23 : vector<256x128xf32>
    %cst_16 = arith.constant dense<0.000000e+00> : vector<256xf32>
    %25 = vector.multi_reduction <add>, %24, %cst_16 [1] : vector<256x128xf32> to vector<256xf32>
    %26 = vector.shape_cast %25 : vector<256xf32> to vector<256x1xf32>
    %27 = math.log %26 : vector<256x1xf32>
    %28 = vector.broadcast %27 : vector<256x1xf32> to vector<256x128xf32>
    %29 = arith.subf %23, %28 : vector<256x128xf32>
    %c0_17 = arith.constant 0 : index
    %c0_18 = arith.constant 0 : index
    %30 = vector.load %arg6[%c0_17, %c0_18] : memref<256x128xf32, #tpu.memory_space<vmem>>, vector<256x128xf32>
    tpu.vector_store %arg6[%c0_17, %c0_18], %29 {strides = array<i32>} : memref<256x128xf32, #tpu.memory_space<vmem>>, vector<256x128xf32>,
    return
  }
}

</mosaic_0001>

<bundles_post_ra>
// kernel: tpu_custom_call.1
= control target key start
LH: loop header
LB: loop body
LE: loop exit
PB: predicated region body
PF: predicated region fallthrough
CT: control target
= control target key end

     0   :  { %11 = vsyncpa [#allocation3], 0  ;;  %s2486_s0 = inlined_call_operand.vmem [shape: s8[256,256], index: 0, kind: input, shape index: {}]   ;;  %s2487_s1 = inlined_call_operand.vmem [shape: bf16[256,16], index: 1, kind: input, shape index: {}]   ;;  %s2488_s2 = inlined_call_operand.vmem [shape: bf16[16,128], index: 2, kind: input, shape index: {}]   ;;  %s2489_s3 = inlined_call_operand.vmem [shape: f32[1,128], index: 3, kind: input, shape index: {}]   ;;  %s2490_s4 = inlined_call_operand.hbm [shape: bf16[128,128], index: 4, kind: input, shape index: {}]   ;;  %s2491_s5 = inlined_call_operand.vmem [shape: f32[1,128], index: 5, kind: input, shape index: {}]   ;;  %s2492_s6 = inlined_call_operand.hbm [shape: f32[256,128], index: 6, kind: output, shape index: {}]  }
   0x1   :  { %12 = vsyncpa [#allocation4], 0  ;;  %s25_s23 = sshll.u32 %s2490_s4, 4  ;;  %s1797_s24 = smov [#allocation2]   ;;  %s26_s23 = int_to_ptr.hbm [resolvable:$true] %s25_s23 }
   0x2   :  { %s27_s25 = sshll.u32 %s1797_s24, 4  ;;  %s1798_s26 = smov 64   ;;  %s28_s25 = int_to_ptr.vmem [resolvable:$true] %s27_s25 }
   0x3   :  { %s1799_s27 = smov 4  }
   0x4   :  { %33 = dma.hbm_to_vmem [thread:$0]  %s26_s23, 1024, %s28_s25, [#allocation3], %s1798_s26, %s1798_s26, %s1799_s27  }
   0x5   :  { %1793 = dma.done.wait [#allocation3], 1024  }
   0x6   :  { %1794 = vsyncadd [#allocation3], 4294966272  ;;  %v1582_v0 = vld [vmem:[%s2487_s1 + $0x38] sm:$0xff]  ;;  %v1581_v1 = vld [vmem:[%s2487_s1 + $0x30] sm:$0xff]  ;;  %vm551_vm0 = vcmask 130048   ;;  %s1446_s21 = sshll.u32 %s2492_s6, 4  ;;  %s1447_s21 = int_to_ptr.hbm [resolvable:$true] %s1446_s21 }
   0x7   :  { %1600 = vmatpush.bf16.msra.mxu1 %v1582_v0  ;;  %345 = vmatpush.bf16.msra.mxu0 %v1582_v0  ;;  %v1580_v2 = vld [vmem:[%s2487_s1 + $0x28] sm:$0xff]  ;;  %v1579_v3 = vld [vmem:[%s2487_s1 + $0x20] sm:$0xff]  ;;  %v1578_v4 = vld [vmem:[%s2487_s1 + $0x18] sm:$0xff]  ;;  %s1801_s22 = smov 128   ;;  %s1802_s23 = smov 8  }
   0x8   :  { %v1577_v5 = vld [vmem:[%s2487_s1 + $0x10] sm:$0xff]  ;;  %v49_v6 = vld [vmem:[%s2486_s0 + $0x40] sm:$0xff]  ;;  %v1576_v9 = vld [vmem:[%s2487_s1 + $0x8] sm:$0xff] }
   0x9   :  { %v89_v7 = vunpack.c.0.s8 %v49_v6  ;;  %v91_v8 = vunpack.c.1.s8 %v49_v6  ;;  %v1575_v12 = vld [vmem:[%s2487_s1] sm:$0xff]  ;;  %v93_v14 = vunpack.c.2.s8 %v49_v6  ;;  %v95_v15 = vunpack.c.3.s8 %v49_v6  ;;  %v51_v19 = vld [vmem:[%s2486_s0 + $0x50] sm:$0xff]  ;;  %v1590_v36 = vld [vmem:[%s2487_s1 + $0x78] sm:$0xff] }
   0xa   :  { %v97_v20 = vunpack.c.0.s8 %v51_v19  ;;  %v99_v21 = vunpack.c.1.s8 %v51_v19  ;;  %v101_v25 = vunpack.c.2.s8 %v51_v19  ;;  %v103_v26 = vunpack.c.3.s8 %v51_v19  ;;  %v53_v30 = vld [vmem:[%s2486_s0 + $0x60] sm:$0xff]  ;;  %v1589_v37 = vld [vmem:[%s2487_s1 + $0x70] sm:$0xff]  ;;  %v1588_v40 = vld [vmem:[%s2487_s1 + $0x68] sm:$0xff] }
   0xb   :  { %1601 = vmatpush.bf16.msra.mxu1 %v1581_v1  ;;  %346 = vmatpush.bf16.msra.mxu0 %v1581_v1  ;;  %v153_v10 = vcvt.s32.f32 %v89_v7  ;;  %v155_v11 = vcvt.s32.f32 %v91_v8  ;;  %v157_v16 = vcvt.s32.f32 %v93_v14  ;;  %v159_v17 = vcvt.s32.f32 %v95_v15  ;;  %v1587_v43 = vld [vmem:[%s2487_s1 + $0x60] sm:$0xff]  ;;  %v1586_v45 = vld [vmem:[%s2487_s1 + $0x58] sm:$0xff]  ;;  %v55_v46 = vld [vmem:[%s2486_s0 + $0x70] sm:$0xff] }
   0xc   :  { %v161_v22 = vcvt.s32.f32 %v97_v20  ;;  %v163_v23 = vcvt.s32.f32 %v99_v21  ;;  %v165_v27 = vcvt.s32.f32 %v101_v25  ;;  %v167_v28 = vcvt.s32.f32 %v103_v26  ;;  %v1585_v47 = vld [vmem:[%s2487_s1 + $0x50] sm:$0xff]  ;;  %v1584_v50 = vld [vmem:[%s2487_s1 + $0x48] sm:$0xff]  ;;  %v41_v53 = vld [vmem:[%s2486_s0] sm:$0xff] }
   0xd   :  { %v1868_v13 = vpack.c.bf16 %v155_v11, %v153_v10  ;;  %v1871_v18 = vpack.c.bf16 %v159_v17, %v157_v16  ;;  %v105_v31 = vunpack.c.0.s8 %v53_v30  ;;  %v107_v32 = vunpack.c.1.s8 %v53_v30  ;;  %v1583_v56 = vld [vmem:[%s2487_s1 + $0x40] sm:$0xff]  ;;  %v42_v7 = vld [vmem:[%s2486_s0 + $0x8] sm:$0xff] }
   0xe   :  { %v1877_v24 = vpack.c.bf16 %v163_v23, %v161_v22  ;;  %v1880_v29 = vpack.c.bf16 %v167_v28, %v165_v27  ;;  %v109_v38 = vunpack.c.2.s8 %v53_v30  ;;  %v111_v39 = vunpack.c.3.s8 %v53_v30 }
   0xf   :  { %1602 = vmatpush.bf16.msra.mxu1 %v1580_v2  ;;  %347 = vmatpush.bf16.msra.mxu0 %v1580_v2  ;;  %v169_v33 = vcvt.s32.f32 %v105_v31  ;;  %v171_v34 = vcvt.s32.f32 %v107_v32  ;;  %v113_v48 = vunpack.c.0.s8 %v55_v46  ;;  %v115_v49 = vunpack.c.1.s8 %v55_v46 }
  0x10   :  { %v173_v41 = vcvt.s32.f32 %v109_v38  ;;  %v175_v42 = vcvt.s32.f32 %v111_v39  ;;  %v57_v54 = vunpack.c.0.s8 %v41_v53  ;;  %v59_v55 = vunpack.c.1.s8 %v41_v53 }
  0x11   :  { %v1886_v35 = vpack.c.bf16 %v171_v34, %v169_v33  ;;  %v177_v51 = vcvt.s32.f32 %v113_v48  ;;  %v179_v52 = vcvt.s32.f32 %v115_v49  ;;  %v117_v61 = vunpack.c.2.s8 %v55_v46 }
  0x12   :  { %v1901_v44 = vpack.c.bf16 %v175_v42, %v173_v41  ;;  %v121_v58 = vcvt.s32.f32 %v57_v54  ;;  %v123_v59 = vcvt.s32.f32 %v59_v55  ;;  %v119_v62 = vunpack.c.3.s8 %v55_v46 }
  0x13   :  { %1603 = vmatpush.bf16.msra.mxu1 %v1579_v3  ;;  %348 = vmatpush.bf16.msra.mxu0 %v1579_v3  ;;  %v1922_v57 = vpack.c.bf16 %v179_v52, %v177_v51  ;;  %v181_v63 = vcvt.s32.f32 %v117_v61  ;;  %v61_v1 = vunpack.c.2.s8 %v41_v53  ;;  %v63_v2 = vunpack.c.3.s8 %v41_v53 }
  0x14   :  { %v1924_v60 = vpack.c.bf16 %v123_v59, %v121_v58  ;;  %v183_v0 = vcvt.s32.f32 %v119_v62  ;;  %v58_v8 = vunpack.c.0.s8 %v42_v7  ;;  %v62_v22 = vunpack.c.2.s8 %v42_v7 }
  0x15   :  { %v64_v23 = vunpack.c.3.s8 %v42_v7 }
  0x16   :  { %v1928_v3 = vpack.c.bf16 %v183_v0, %v181_v63  ;;  %v122_v10 = vcvt.s32.f32 %v58_v8  ;;  %v126_v26 = vcvt.s32.f32 %v62_v22 }
  0x17   :  { %1604 = vmatpush.bf16.msra.mxu1 %v1578_v4  ;;  %349 = vmatpush.bf16.msra.mxu0 %v1578_v4  ;;  %v125_v4 = vcvt.s32.f32 %v61_v1  ;;  %v128_v27 = vcvt.s32.f32 %v64_v23 }
  0x18   :  { %2498 = vst [vmem:[#allocation8_spill] sm:$0xff] %v1928_v3 }
  0x19   :  { %v1950_v31 = vpack.c.bf16 %v128_v27, %v126_v26 }
  0x1b   :  { %1605 = vmatpush.bf16.msra.mxu1 %v1577_v5  ;;  %350 = vmatpush.bf16.msra.mxu0 %v1577_v5  ;;  %v127_v5 = vcvt.s32.f32 %v63_v2  ;;  %v46_v2 = vld [vmem:[%s2486_s0 + $0x28] sm:$0xff] }
  0x1c   :  { %v78_v23 = vunpack.c.2.s8 %v46_v2  ;;  %v80_v26 = vunpack.c.3.s8 %v46_v2 }
  0x1d   :  { %v1930_v6 = vpack.c.bf16 %v127_v5, %v125_v4  ;;  %v74_v4 = vunpack.c.0.s8 %v46_v2  ;;  %v76_v5 = vunpack.c.1.s8 %v46_v2 }
  0x1f   :  { %1606 = vmatpush.bf16.msra.mxu1 %v1576_v9  ;;  %351 = vmatpush.bf16.msra.mxu0 %v1576_v9  ;;  %v60_v9 = vunpack.c.1.s8 %v42_v7  ;;  %v138_v8 = vcvt.s32.f32 %v74_v4 }
  0x21   :  { %v124_v11 = vcvt.s32.f32 %v60_v9  ;;  %v140_v9 = vcvt.s32.f32 %v76_v5 }
  0x23   :  { %1607 = vmatpush.bf16.msra.mxu1 %v1575_v12  ;;  %352 = vmatpush.bf16.msra.mxu0 %v1575_v12  ;;  %v43_v12 = vld [vmem:[%s2486_s0 + $0x10] sm:$0xff]  ;;  %v1940_v16 = vpack.c.bf16 %v124_v11, %v122_v10 }
  0x24   :  { %v65_v14 = vunpack.c.0.s8 %v43_v12  ;;  %v67_v15 = vunpack.c.1.s8 %v43_v12  ;;  %v69_v28 = vunpack.c.2.s8 %v43_v12  ;;  %v71_v30 = vunpack.c.3.s8 %v43_v12  ;;  %v47_v10 = vld [vmem:[%s2486_s0 + $0x30] sm:$0xff] }
  0x25   :  { %v81_v11 = vunpack.c.0.s8 %v47_v10  ;;  %v83_v12 = vunpack.c.1.s8 %v47_v10 }
  0x26   :  { %393 = vmatmul.bf16.vlgmr.msra.gmra.mxu1 %v1868_v13  ;;  %353 = vmatmul.bf16.vlgmr.msra.gmra.mxu0 %v1924_v60  ;;  %v129_v17 = vcvt.s32.f32 %v65_v14  ;;  %v131_v19 = vcvt.s32.f32 %v67_v15  ;;  %v133_v32 = vcvt.s32.f32 %v69_v28  ;;  %v135_v33 = vcvt.s32.f32 %v71_v30 }
  0x27   :  { %434 = vmatpush.bf16.msrb.mxu1 %v1590_v36  ;;  %v1992_v14 = vpack.c.bf16 %v140_v9, %v138_v8  ;;  %v145_v15 = vcvt.s32.f32 %v81_v11  ;;  %v142_v28 = vcvt.s32.f32 %v78_v23  ;;  %v144_v30 = vcvt.s32.f32 %v80_v26 }
  0x28   :  { %v1944_v21 = vpack.c.bf16 %v131_v19, %v129_v17  ;;  %v1954_v36 = vpack.c.bf16 %v135_v33, %v133_v32  ;;  %v147_v17 = vcvt.s32.f32 %v83_v12  ;;  %v85_v32 = vunpack.c.2.s8 %v47_v10 }
  0x29   :  { %v87_v33 = vunpack.c.3.s8 %v47_v10  ;;  %v50_v10 = vld [vmem:[%s2486_s0 + $0x48] sm:$0xff] }
  0x2a   :  { %v1996_v22 = vpack.c.bf16 %v147_v17, %v145_v15  ;;  %v90_v12 = vunpack.c.0.s8 %v50_v10  ;;  %v92_v15 = vunpack.c.1.s8 %v50_v10 }
  0x2b   :  { %435 = vmatpush.bf16.msrb.mxu1 %v1589_v37  ;;  %v44_v37 = vld [vmem:[%s2486_s0 + $0x18] sm:$0xff] }
  0x2c   :  { %v66_v38 = vunpack.c.0.s8 %v44_v37  ;;  %v68_v39 = vunpack.c.1.s8 %v44_v37  ;;  %v70_v52 = vunpack.c.2.s8 %v44_v37  ;;  %v72_v53 = vunpack.c.3.s8 %v44_v37 }
  0x2d   :  { %v2002_v37 = vpack.c.bf16 %v144_v30, %v142_v28  ;;  %v154_v23 = vcvt.s32.f32 %v90_v12  ;;  %v156_v26 = vcvt.s32.f32 %v92_v15 }
  0x2e   :  { %v130_v41 = vcvt.s32.f32 %v66_v38  ;;  %v132_v42 = vcvt.s32.f32 %v68_v39  ;;  %v134_v55 = vcvt.s32.f32 %v70_v52  ;;  %v149_v38 = vcvt.s32.f32 %v85_v32 }
  0x2f   :  { %436 = vmatpush.bf16.msrb.mxu1 %v1588_v40  ;;  %v151_v39 = vcvt.s32.f32 %v87_v33  ;;  %v2035_v30 = vpack.c.bf16 %v156_v26, %v154_v23  ;;  %v94_v33 = vunpack.c.2.s8 %v50_v10 }
  0x33   :  { %437 = vmatpush.bf16.msrb.mxu1 %v1587_v43  ;;  %v45_v43 = vld [vmem:[%s2486_s0 + $0x20] sm:$0xff] }
  0x34   :  { %v75_v46 = vunpack.c.1.s8 %v45_v43  ;;  %v77_v58 = vunpack.c.2.s8 %v45_v43  ;;  %v79_v59 = vunpack.c.3.s8 %v45_v43 }
  0x36   :  { %398 = vmatmul.bf16.gmra.mxu1 %v1871_v18  ;;  %358 = vmatmul.bf16.gmra.mxu0 %v1930_v6  ;;  %v139_v49 = vcvt.s32.f32 %v75_v46  ;;  %v141_v62 = vcvt.s32.f32 %v77_v58  ;;  %v143_v63 = vcvt.s32.f32 %v79_v59 }
  0x37   :  { %438 = vmatpush.bf16.msrb.mxu1 %v1586_v45  ;;  %v73_v45 = vunpack.c.0.s8 %v45_v43  ;;  %v48_v43 = vld [vmem:[%s2486_s0 + $0x38] sm:$0xff] }
  0x38   :  { %v1980_v1 = vpack.c.bf16 %v143_v63, %v141_v62  ;;  %v84_v46 = vunpack.c.1.s8 %v48_v43  ;;  %v86_v58 = vunpack.c.2.s8 %v48_v43  ;;  %v88_v59 = vunpack.c.3.s8 %v48_v43  ;;  %v1591_v63 = vld [vmem:[%s2488_s2] sm:$0xff] }
  0x39   :  { %v137_v48 = vcvt.s32.f32 %v73_v45  ;;  %v82_v45 = vunpack.c.0.s8 %v48_v43  ;;  %607 = vmatpush.bf16.msra.mxu2 %v1591_v63  ;;  %1608 = vmatpush.bf16.msra.mxu3 %v1591_v63 }
  0x3a   :  { %v148_v52 = vcvt.s32.f32 %v84_v46  ;;  %v150_v4 = vcvt.s32.f32 %v86_v58  ;;  %v152_v5 = vcvt.s32.f32 %v88_v59 }
  0x3b   :  { %439 = vmatpush.bf16.msrb.mxu1 %v1585_v47  ;;  %v1966_v47 = vpack.c.bf16 %v132_v42, %v130_v41  ;;  %v1970_v51 = vpack.c.bf16 %v139_v49, %v137_v48  ;;  %v2006_v42 = vpack.c.bf16 %v151_v39, %v149_v38  ;;  %v146_v49 = vcvt.s32.f32 %v82_v45 }
  0x3c   :  { %v2025_v8 = vpack.c.bf16 %v152_v5, %v150_v4  ;;  %v96_v38 = vunpack.c.3.s8 %v50_v10  ;;  %v52_v5 = vld [vmem:[%s2486_s0 + $0x58] sm:$0xff] }
  0x3d   :  { %v98_v10 = vunpack.c.0.s8 %v52_v5  ;;  %v100_v12 = vunpack.c.1.s8 %v52_v5 }
  0x3e   :  { %v160_v58 = vcvt.s32.f32 %v96_v38 }
  0x3f   :  { %440 = vmatpush.bf16.msrb.mxu1 %v1584_v50  ;;  %v162_v26 = vcvt.s32.f32 %v98_v10 }
  0x43   :  { %441 = vmatpush.bf16.msrb.mxu1 %v1583_v56  ;;  %v136_v56 = vcvt.s32.f32 %v72_v53  ;;  %v2015_v53 = vpack.c.bf16 %v148_v52, %v146_v49  ;;  %v158_v52 = vcvt.s32.f32 %v94_v33 }
  0x45   :  { %v1976_v61 = vpack.c.bf16 %v136_v56, %v134_v55  ;;  %v2039_v59 = vpack.c.bf16 %v160_v58, %v158_v52 }
  0x46   :  { %403 = vmatmul.bf16.gmra.mxu1 %v1877_v24  ;;  %363 = vmatmul.bf16.gmra.mxu0 %v1944_v21 }
  0x47   :  { %2499 = vst [vmem:[#allocation9_spill] sm:$0xff] %v2039_v59 }
  0x56   :  { %408 = vmatmul.bf16.gmra.mxu1 %v1880_v29  ;;  %368 = vmatmul.bf16.gmra.mxu0 %v1954_v36 }
  0x66   :  { %413 = vmatmul.bf16.gmra.mxu1 %v1886_v35  ;;  %373 = vmatmul.bf16.gmra.mxu0 %v1970_v51 }
  0x76   :  { %418 = vmatmul.bf16.gmra.mxu1 %v1901_v44  ;;  %378 = vmatmul.bf16.gmra.mxu0 %v1980_v1 }
  0x86   :  { %423 = vmatmul.bf16.gmra.mxu1 %v1922_v57  ;;  %383 = vmatmul.bf16.gmra.mxu0 %v1996_v22 }
  0x96   :  { %428 = vmatmul.bf16.gmra.mxu1 %v1928_v3  ;;  %388 = vmatmul.bf16.gmra.mxu0 %v2006_v42 }
  0xa3   :  { %v1942_v20 = vpop.f32.mrf.mxu1  ;;  %v354_v56 = vpop.f32.mrf.mxu0 }
  0xa6   :  { %442 = vmatmul.bf16.vlgmr.msrb.gmra.mxu1 %v1940_v16 }
  0xab   :  { %v1948_v25 = vpop.f32.mrf.mxu1  ;;  %v356_v2 = vpop.f32.mrf.mxu0 }
  0xb3   :  { %v1952_v34 = vpop.f32.mrf.mxu1  ;;  %v359_v11 = vpop.f32.mrf.mxu0 }
  0xb6   :  { %447 = vmatmul.bf16.gmra.mxu1 %v1950_v31 }
  0xbb   :  { %v1961_v40 = vpop.f32.mrf.mxu1  ;;  %v361_v28 = vpop.f32.mrf.mxu0 }
  0xc3   :  { %v1968_v50 = vpop.f32.mrf.mxu1  ;;  %v364_v43 = vpop.f32.mrf.mxu0 }
  0xc6   :  { %452 = vmatmul.bf16.gmra.mxu1 %v1966_v47 }
  0xcb   :  { %v1974_v54 = vpop.f32.mrf.mxu1  ;;  %v366_v4 = vpop.f32.mrf.mxu0 }
  0xd3   :  { %v1978_v0 = vpop.f32.mrf.mxu1  ;;  %v369_v33 = vpop.f32.mrf.mxu0 }
  0xd6   :  { %457 = vmatmul.bf16.gmra.mxu1 %v1976_v61 }
  0xdb   :  { %v1987_v7 = vpop.f32.mrf.mxu1 }
  0xe3   :  { %v1994_v19 = vpop.f32.mrf.mxu1 }
  0xe6   :  { %462 = vmatmul.bf16.gmra.mxu1 %v1992_v14 }
  0xeb   :  { %v2000_v27 = vpop.f32.mrf.mxu1 }
  0xf3   :  { %v2004_v41 = vpop.f32.mrf.mxu1 }
  0xf6   :  { %467 = vmatmul.bf16.gmra.mxu1 %v2002_v37 }
  0xfb   :  { %v2013_v48 = vpop.f32.mrf.mxu1 }
 0x103   :  { %v2017_v55 = vpop.f32.mrf.mxu1 }
 0x106   :  { %472 = vmatmul.bf16.gmra.mxu1 %v2015_v53 }
 0x10b   :  { %v2020_v62 = vpop.f32.mrf.mxu1 }
 0x113   :  { %v2027_v9 = vpop.f32.mrf.mxu1 }
 0x116   :  { %477 = vmatmul.bf16.gmra.mxu1 %v2025_v8 }
 0x11b   :  { %v2033_v17 = vpop.f32.mrf.mxu1 }
 0x123   :  { %v443_v32 = vpop.f32.mrf.mxu1 }
 0x124   :  { %v444_v45 = vadd.f32 %v443_v32, %v354_v56  ;;  %v164_v32 = vcvt.s32.f32 %v100_v12 }
 0x126   :  { %482 = vmatmul.bf16.gmra.mxu1 %v2035_v30  ;;  %v2046_v38 = vpack.c.bf16 %v164_v32, %v162_v26 }
 0x12b   :  { %v445_v39 = vpop.f32.mrf.mxu1 }
 0x12c   :  { %v446_v46 = vadd.f32 %v445_v39, %v356_v2 }
 0x12e   :  { %v523_v49 = vpack.c.bf16 %v446_v46, %v444_v45  ;;  %v371_v45 = vpop.f32.mrf.mxu0  ;;  %v102_v46 = vunpack.c.2.s8 %v52_v5 }
 0x130   :  { %1527 = vmatmul.msk.bf16.vlgmr.msra.gmra.mxu2 %vm551_vm0, %v523_v49  ;;  %v104_v49 = vunpack.c.3.s8 %v52_v5 }
 0x133   :  { %v448_v63 = vpop.f32.mrf.mxu1 }
 0x134   :  { %v449_v2 = vadd.f32 %v448_v63, %v359_v11  ;;  %v166_v11 = vcvt.s32.f32 %v102_v46 }
 0x136   :  { %487 = vmatmul.bf16.gmra.mxu1 %v2039_v59  ;;  %v374_v12 = vpop.f32.mrf.mxu0 }
 0x13b   :  { %v450_v56 = vpop.f32.mrf.mxu1 }
 0x13c   :  { %v451_v15 = vadd.f32 %v450_v56, %v361_v28  ;;  %v168_v28 = vcvt.s32.f32 %v104_v49  ;;  %v54_v56 = vld [vmem:[%s2486_s0 + $0x68] sm:$0xff] }
 0x13d   :  { %v108_v5 = vunpack.c.1.s8 %v54_v56  ;;  %v110_v49 = vunpack.c.2.s8 %v54_v56 }
 0x13e   :  { %v524_v23 = vpack.c.bf16 %v451_v15, %v449_v2  ;;  %v2050_v63 = vpack.c.bf16 %v168_v28, %v166_v11  ;;  %v106_v2 = vunpack.c.0.s8 %v54_v56 }
 0x13f   :  { %v172_v32 = vcvt.s32.f32 %v108_v5 }
 0x140   :  { %1528 = vmatmul.msk.bf16.gmra.mxu2 %vm551_vm0, %v524_v23  ;;  %2500 = vst [vmem:[#allocation10_spill] sm:$0xff] %v2050_v63  ;;  %v170_v26 = vcvt.s32.f32 %v106_v2 }
 0x143   :  { %v453_v39 = vpop.f32.mrf.mxu1 }
 0x144   :  { %v454_v58 = vadd.f32 %v453_v39, %v364_v43 }
 0x146   :  { %492 = vmatmul.bf16.gmra.mxu1 %v2046_v38 }
 0x14b   :  { %v455_v52 = vpop.f32.mrf.mxu1 }
 0x14c   :  { %v456_v3 = vadd.f32 %v455_v52, %v366_v4  ;;  %v112_v52 = vunpack.c.3.s8 %v54_v56 }
 0x14e   :  { %v525_v59 = vpack.c.bf16 %v456_v3, %v454_v58  ;;  %v376_v3 = vpop.f32.mrf.mxu0 }
 0x150   :  { %1529 = vmatmul.msk.bf16.gmra.mxu2 %vm551_vm0, %v525_v59  ;;  %v2057_v59 = vpack.c.bf16 %v172_v32, %v170_v26 }
 0x152   :  { %2501 = vst [vmem:[#allocation11_spill] sm:$0xff] %v2057_v59 }
 0x153   :  { %v458_v10 = vpop.f32.mrf.mxu1 }
 0x154   :  { %v459_v43 = vadd.f32 %v458_v10, %v369_v33  ;;  %v174_v33 = vcvt.s32.f32 %v110_v49 }
 0x156   :  { %497 = vmatmul.bf16.gmra.mxu1 %v2050_v63  ;;  %v379_v46 = vpop.f32.mrf.mxu0 }
 0x15b   :  { %v460_v15 = vpop.f32.mrf.mxu1 }
 0x15c   :  { %v461_v4 = vadd.f32 %v460_v15, %v371_v45  ;;  %v176_v45 = vcvt.s32.f32 %v112_v52  ;;  %v56_v15 = vld [vmem:[%s2486_s0 + $0x78] sm:$0xff] }
 0x15d   :  { %v116_v56 = vunpack.c.1.s8 %v56_v15 }
 0x15e   :  { %v526_v23 = vpack.c.bf16 %v461_v4, %v459_v43  ;;  %v381_v10 = vpop.f32.mrf.mxu0  ;;  %v2061_v2 = vpack.c.bf16 %v176_v45, %v174_v33  ;;  %v114_v43 = vunpack.c.0.s8 %v56_v15 }
 0x160   :  { %1530 = vmatmul.msk.bf16.gmra.mxu2 %vm551_vm0, %v526_v23  ;;  %2502 = vst [vmem:[#allocation12_spill] sm:$0xff] %v2061_v2  ;;  %v178_v32 = vcvt.s32.f32 %v114_v43 }
 0x163   :  { %v463_v39 = vpop.f32.mrf.mxu1 }
 0x164   :  { %v464_v11 = vadd.f32 %v463_v39, %v374_v12  ;;  %v180_v39 = vcvt.s32.f32 %v116_v56 }
 0x166   :  { %502 = vmatmul.bf16.gmra.mxu1 %v2057_v59  ;;  %v384_v12 = vpop.f32.mrf.mxu0 }
 0x16b   :  { %v465_v58 = vpop.f32.mrf.mxu1 }
 0x16c   :  { %v466_v28 = vadd.f32 %v465_v58, %v376_v3  ;;  %v118_v58 = vunpack.c.2.s8 %v56_v15 }
 0x16e   :  { %v527_v63 = vpack.c.bf16 %v466_v28, %v464_v11  ;;  %v386_v52 = vpop.f32.mrf.mxu0  ;;  %v120_v11 = vunpack.c.3.s8 %v56_v15  ;;  %v182_v59 = vcvt.s32.f32 %v118_v58 }
 0x170   :  { %1531 = vmatmul.msk.bf16.gmra.mxu2 %vm551_vm0, %v527_v63  ;;  %v2068_v63 = vpack.c.bf16 %v180_v39, %v178_v32 }
 0x173   :  { %v468_v5 = vpop.f32.mrf.mxu1 }
 0x174   :  { %v469_v3 = vadd.f32 %v468_v5, %v379_v46  ;;  %v184_v46 = vcvt.s32.f32 %v120_v11 }
 0x176   :  { %507 = vmatmul.bf16.gmra.mxu1 %v2061_v2  ;;  %v2072_v5 = vpack.c.bf16 %v184_v46, %v182_v59 }
 0x17b   :  { %v470_v4 = vpop.f32.mrf.mxu1 }
 0x17c   :  { %v471_v23 = vadd.f32 %v470_v4, %v381_v10  ;;  %v389_v10 = vpop.f32.mrf.mxu0 }
 0x17e   :  { %v528_v26 = vpack.c.bf16 %v471_v23, %v469_v3 }
 0x180   :  { %1532 = vmatmul.msk.bf16.gmra.mxu2 %vm551_vm0, %v528_v26 }
 0x183   :  { %v473_v49 = vpop.f32.mrf.mxu1 }
 0x184   :  { %v474_v33 = vadd.f32 %v473_v49, %v384_v12  ;;  %v391_v56 = vpop.f32.mrf.mxu0 }
 0x186   :  { %512 = vmatmul.bf16.gmra.mxu1 %v2068_v63 }
 0x18b   :  { %v475_v28 = vpop.f32.mrf.mxu1 }
 0x18c   :  { %v476_v45 = vadd.f32 %v475_v28, %v386_v52 }
 0x18e   :  { %v529_v2 = vpack.c.bf16 %v476_v45, %v474_v33 }
 0x190   :  { %1533 = vmatmul.msk.bf16.gmra.mxu2 %vm551_vm0, %v529_v2 }
 0x193   :  { %v478_v43 = vpop.f32.mrf.mxu1 }
 0x194   :  { %v479_v3 = vadd.f32 %v478_v43, %v389_v10 }
 0x196   :  { %517 = vmatmul.bf16.gmra.mxu1 %v2072_v5 }
 0x19b   :  { %v480_v4 = vpop.f32.mrf.mxu1 }
 0x19c   :  { %v481_v23 = vadd.f32 %v480_v4, %v391_v56 }
 0x19e   :  { %v530_v26 = vpack.c.bf16 %v481_v23, %v479_v3 }
 0x1a0   :  { %1534 = vmatmul.msk.bf16.gmra.mxu2 %vm551_vm0, %v530_v26 }
 0x1a3   :  { %v483_v15 = vpop.f32.mrf.mxu1 }
 0x1a4   :  { %v484_v32 = vadd.f32 %v483_v15, %v1942_v20 }
 0x1ab   :  { %v485_v12 = vpop.f32.mrf.mxu1 }
 0x1ac   :  { %v486_v39 = vadd.f32 %v485_v12, %v1948_v25 }
 0x1ae   :  { %v531_v49 = vpack.c.bf16 %v486_v39, %v484_v32 }
 0x1b0   :  { %1535 = vmatmul.msk.bf16.gmra.mxu2 %vm551_vm0, %v531_v49 }
 0x1b3   :  { %v488_v59 = vpop.f32.mrf.mxu1  ;;  %v2079_v2 = vpop.f32.mrf.mxu2 }
 0x1b4   :  { %v489_v11 = vadd.f32 %v488_v59, %v1952_v34 }
 0x1bb   :  { %v490_v52 = vpop.f32.mrf.mxu1  ;;  %v2081_v58 = vpop.f32.mrf.mxu2 }
 0x1bc   :  { %v491_v28 = vadd.f32 %v490_v52, %v1961_v40 }
 0x1be   :  { %v532_v33 = vpack.c.bf16 %v491_v28, %v489_v11 }
 0x1c0   :  { %1536 = vmatmul.msk.bf16.vlgmr.msra.gmra.mxu3 %vm551_vm0, %v532_v33 }
 0x1c3   :  { %v493_v45 = vpop.f32.mrf.mxu1  ;;  %v2086_v20 = vpop.f32.mrf.mxu2 }
 0x1c4   :  { %v494_v10 = vadd.f32 %v493_v45, %v1968_v50 }
 0x1cb   :  { %v495_v25 = vpop.f32.mrf.mxu1  ;;  %v2088_v46 = vpop.f32.mrf.mxu2 }
 0x1cc   :  { %v496_v43 = vadd.f32 %v495_v25, %v1974_v54 }
 0x1ce   :  { %v533_v56 = vpack.c.bf16 %v496_v43, %v494_v10 }
 0x1d0   :  { %1537 = vmatmul.msk.bf16.gmra.mxu3 %vm551_vm0, %v533_v56 }
 0x1d3   :  { %v498_v4 = vpop.f32.mrf.mxu1  ;;  %v2093_v34 = vpop.f32.mrf.mxu2 }
 0x1d4   :  { %v499_v23 = vadd.f32 %v498_v4, %v1978_v0 }
 0x1db   :  { %v500_v40 = vpop.f32.mrf.mxu1  ;;  %v2095_v3 = vpop.f32.mrf.mxu2 }
 0x1dc   :  { %v501_v26 = vadd.f32 %v500_v40, %v1987_v7 }
 0x1de   :  { %v534_v15 = vpack.c.bf16 %v501_v26, %v499_v23 }
 0x1e0   :  { %1538 = vmatmul.msk.bf16.gmra.mxu3 %vm551_vm0, %v534_v15 }
 0x1e3   :  { %v503_v12 = vpop.f32.mrf.mxu1  ;;  %v624_v50 = vpop.f32.mrf.mxu2 }
 0x1e4   :  { %v504_v39 = vadd.f32 %v503_v12, %v1994_v19 }
 0x1eb   :  { %v505_v32 = vpop.f32.mrf.mxu1  ;;  %v626_v54 = vpop.f32.mrf.mxu2 }
 0x1ec   :  { %v506_v49 = vadd.f32 %v505_v32, %v2000_v27 }
 0x1ee   :  { %v535_v59 = vpack.c.bf16 %v506_v49, %v504_v39 }
 0x1f0   :  { %1539 = vmatmul.msk.bf16.gmra.mxu3 %vm551_vm0, %v535_v59 }
 0x1f3   :  { %v508_v52 = vpop.f32.mrf.mxu1  ;;  %v629_v11 = vpop.f32.mrf.mxu2 }
 0x1f4   :  { %v509_v7 = vadd.f32 %v508_v52, %v2004_v41 }
 0x1fb   :  { %v510_v28 = vpop.f32.mrf.mxu1  ;;  %v631_v0 = vpop.f32.mrf.mxu2 }
 0x1fc   :  { %v511_v33 = vadd.f32 %v510_v28, %v2013_v48 }
 0x1fe   :  { %v536_v45 = vpack.c.bf16 %v511_v33, %v509_v7 }
 0x200   :  { %1540 = vmatmul.msk.bf16.gmra.mxu3 %vm551_vm0, %v536_v45 }
 0x203   :  { %v513_v25 = vpop.f32.mrf.mxu1  ;;  %v634_v10 = vpop.f32.mrf.mxu2 }
 0x204   :  { %v514_v27 = vadd.f32 %v513_v25, %v2017_v55  ;;  %v2115_v55 = vld [vmem:[%s2489_s3] ss:$0 sm:$0xff] }
 0x205   :  { %v635_v45 = vadd.f32 %v2115_v55, %v634_v10  ;;  %v622_v10 = vadd.f32 %v2115_v55, %v2095_v3  ;;  %v612_v3 = vadd.f32 %v2115_v55, %v2081_v58 }
 0x20b   :  { %v515_v43 = vpop.f32.mrf.mxu1  ;;  %v636_v19 = vpop.f32.mrf.mxu2 }
 0x20c   :  { %v516_v56 = vadd.f32 %v515_v43, %v2020_v62  ;;  %v637_v28 = vadd.f32 %v2115_v55, %v636_v19  ;;  %v632_v43 = vadd.f32 %v2115_v55, %v631_v0  ;;  %v625_v19 = vadd.f32 %v2115_v55, %v624_v50 }
 0x20d   :  { %v620_v0 = vadd.f32 %v2115_v55, %v2093_v34  ;;  %v615_v50 = vadd.f32 %v2115_v55, %v2086_v20  ;;  %v610_v34 = vadd.f32 %v2115_v55, %v2079_v2 }
 0x20e   :  { %v537_v4 = vpack.c.bf16 %v516_v56, %v514_v27  ;;  %v700_v27 = vmax.f32 %v637_v28, 0.0 }
 0x20f   :  { %v689_v28 = vmax.f32 %v610_v34, 0.0 }
 0x210   :  { %1541 = vmatmul.msk.bf16.gmra.mxu3 %vm551_vm0, %v537_v4  ;;  %v630_v4 = vadd.f32 %v2115_v55, %v629_v11  ;;  %v617_v11 = vadd.f32 %v2115_v55, %v2088_v46  ;;  %v690_v46 = vmax.f32 %v612_v3, 0.0 }
 0x212   :  { %v721_v20 = vpack.c.bf16 %v690_v46, %v689_v28 }
 0x213   :  { %v518_v40 = vpop.f32.mrf.mxu1  ;;  %v639_v23 = vpop.f32.mrf.mxu2 }
 0x214   :  { %v519_v48 = vadd.f32 %v518_v40, %v2027_v9  ;;  %v640_v9 = vadd.f32 %v2115_v55, %v639_v23  ;;  %v699_v40 = vmax.f32 %v635_v45, 0.0  ;;  %v627_v23 = vadd.f32 %v2115_v55, %v626_v54 }
 0x215   :  { %v694_v54 = vmax.f32 %v622_v10, 0.0 }
 0x216   :  { %v701_v25 = vmax.f32 %v640_v9, 0.0 }
 0x21b   :  { %v520_v26 = vpop.f32.mrf.mxu1  ;;  %v641_v41 = vpop.f32.mrf.mxu2 }
 0x21c   :  { %v521_v15 = vadd.f32 %v520_v26, %v2033_v17  ;;  %v642_v49 = vadd.f32 %v2115_v55, %v641_v41  ;;  %v698_v26 = vmax.f32 %v632_v43, 0.0  ;;  %v726_v41 = vpack.c.bf16 %v700_v27, %v699_v40 }
 0x21e   :  { %v538_v12 = vpack.c.bf16 %v521_v15, %v519_v48  ;;  %v702_v7 = vmax.f32 %v642_v49, 0.0  ;;  %v697_v48 = vmax.f32 %v630_v4, 0.0  ;;  %v696_v15 = vmax.f32 %v627_v23, 0.0 }
 0x220   :  { %1542 = vmatmul.msk.bf16.gmra.mxu3 %vm551_vm0, %v538_v12  ;;  %v727_v56 = vpack.c.bf16 %v702_v7, %v701_v25  ;;  %v725_v12 = vpack.c.bf16 %v698_v26, %v697_v48 }
 0x223   :  { %v644_v32 = vpop.f32.mrf.mxu2 }
 0x224   :  { %v645_v62 = vadd.f32 %v2115_v55, %v644_v32  ;;  %v695_v32 = vmax.f32 %v625_v19, 0.0 }
 0x226   :  { %v703_v52 = vmax.f32 %v645_v62, 0.0  ;;  %v724_v62 = vpack.c.bf16 %v696_v15, %v695_v32 }
 0x22b   :  { %v646_v39 = vpop.f32.mrf.mxu2 }
 0x22c   :  { %v647_v59 = vadd.f32 %v2115_v55, %v646_v39  ;;  %v693_v39 = vmax.f32 %v620_v0, 0.0 }
 0x22e   :  { %v704_v17 = vmax.f32 %v647_v59, 0.0  ;;  %v692_v59 = vmax.f32 %v617_v11, 0.0  ;;  %v723_v9 = vpack.c.bf16 %v694_v54, %v693_v39 }
 0x230   :  { %v728_v33 = vpack.c.bf16 %v704_v17, %v703_v52  ;;  %v691_v52 = vmax.f32 %v615_v50, 0.0 }
 0x232   :  { %737 = vmatpush.bf16.msrb.mxu3 %v728_v33  ;;  %v722_v17 = vpack.c.bf16 %v692_v59, %v691_v52 }
 0x236   :  { %738 = vmatpush.bf16.msrb.mxu3 %v727_v56 }
 0x23a   :  { %739 = vmatpush.bf16.msrb.mxu3 %v726_v41 }
 0x23e   :  { %740 = vmatpush.bf16.msrb.mxu3 %v725_v12 }
 0x242   :  { %741 = vmatpush.bf16.msrb.mxu3 %v724_v62  ;;  %v649_v62 = vpop.f32.mrf.mxu2 }
 0x243   :  { %v2135_v49 = vpop.f32.mrf.mxu3 }
 0x246   :  { %742 = vmatpush.bf16.msrb.mxu3 %v723_v9 }
 0x24a   :  { %743 = vmatpush.bf16.msrb.mxu3 %v722_v17 }
 0x24b   :  { %v656_v7 = vpop.f32.mrf.mxu3 }
 0x24c   :  { %v657_v28 = vadd.f32 %v2115_v55, %v656_v7 }
 0x24e   :  { %744 = vmatpush.bf16.msrb.mxu3 %v721_v20 }
 0x251   :  { %745 = vmatmul.bf16.vlgmr.msrb.gmra.mxu3 %v1924_v60 }
 0x253   :  { %v659_v33 = vpop.f32.mrf.mxu3 }
 0x254   :  { %v660_v46 = vadd.f32 %v2115_v55, %v659_v33  ;;  %v650_v33 = vadd.f32 %v2115_v55, %v649_v62 }
 0x25b   :  { %v661_v45 = vpop.f32.mrf.mxu3 }
 0x25c   :  { %v662_v9 = vadd.f32 %v2115_v55, %v661_v45 }
 0x25e   :  { %v710_v20 = vmax.f32 %v662_v9, 0.0 }
 0x261   :  { %750 = vmatmul.bf16.gmra.mxu3 %v1930_v6 }
 0x263   :  { %v664_v58 = vpop.f32.mrf.mxu3 }
 0x264   :  { %v665_v59 = vadd.f32 %v2115_v55, %v664_v58  ;;  %v655_v58 = vadd.f32 %v2115_v55, %v2135_v49 }
 0x266   :  { %v711_v17 = vmax.f32 %v665_v59, 0.0 }
 0x26b   :  { %v666_v25 = vpop.f32.mrf.mxu3 }
 0x26c   :  { %v667_v50 = vadd.f32 %v2115_v55, %v666_v25  ;;  %v709_v25 = vmax.f32 %v660_v46, 0.0  ;;  %v2506_v46 = vld [vmem:[#allocation11_spill] sm:$0xff] }
 0x26e   :  { %v712_v34 = vmax.f32 %v667_v50, 0.0  ;;  %v2505_v50 = vld [vmem:[#allocation10_spill] sm:$0xff] }
 0x271   :  { %755 = vmatmul.bf16.gmra.mxu3 %v1944_v21 }
 0x273   :  { %v669_v2 = vpop.f32.mrf.mxu3 }
 0x274   :  { %v670_v11 = vadd.f32 %v2115_v55, %v669_v2  ;;  %v732_v2 = vpack.c.bf16 %v712_v34, %v711_v17 }
 0x27b   :  { %v671_v43 = vpop.f32.mrf.mxu3 }
 0x27c   :  { %v672_v12 = vadd.f32 %v2115_v55, %v671_v43  ;;  %v651_v43 = vpop.f32.mrf.mxu2 }
 0x27d   :  { %v652_v45 = vadd.f32 %v2115_v55, %v651_v43 }
 0x27e   :  { %v714_v39 = vmax.f32 %v672_v12, 0.0 }
 0x281   :  { %760 = vmatmul.bf16.gmra.mxu3 %v1954_v36 }
 0x283   :  { %v674_v27 = vpop.f32.mrf.mxu3 }
 0x28b   :  { %v676_v56 = vpop.f32.mrf.mxu3 }
 0x28c   :  { %v677_v48 = vadd.f32 %v2115_v55, %v676_v56  ;;  %v731_v56 = vpack.c.bf16 %v710_v20, %v709_v25 }
 0x28e   :  { %v716_v0 = vmax.f32 %v677_v48, 0.0 }
 0x291   :  { %765 = vmatmul.bf16.gmra.mxu3 %v1970_v51 }
 0x293   :  { %v679_v4 = vpop.f32.mrf.mxu3 }
 0x294   :  { %v680_v41 = vadd.f32 %v2115_v55, %v679_v4  ;;  %v707_v4 = vmax.f32 %v655_v58, 0.0  ;;  %v2507_v58 = vld [vmem:[#allocation12_spill] sm:$0xff] }
 0x296   :  { %v717_v15 = vmax.f32 %v680_v41, 0.0 }
 0x29b   :  { %v681_v40 = vpop.f32.mrf.mxu3 }
 0x29c   :  { %v682_v26 = vadd.f32 %v2115_v55, %v681_v40  ;;  %v706_v40 = vmax.f32 %v652_v45, 0.0 }
 0x29e   :  { %v718_v10 = vmax.f32 %v682_v26, 0.0 }
 0x2a0   :  { %v735_v32 = vpack.c.bf16 %v718_v10, %v717_v15  ;;  %v2504_v10 = vld [vmem:[#allocation8_spill] sm:$0xff] }
 0x2a1   :  { %770 = vmatmul.bf16.gmra.mxu3 %v1980_v1  ;;  %v675_v1 = vadd.f32 %v2115_v55, %v674_v27  ;;  %v708_v27 = vmax.f32 %v657_v28, 0.0 }
 0x2a3   :  { %v684_v60 = vpop.f32.mrf.mxu3  ;;  %v715_v54 = vmax.f32 %v675_v1, 0.0  ;;  %v730_v7 = vpack.c.bf16 %v708_v27, %v707_v4 }
 0x2a4   :  { %v685_v23 = vadd.f32 %v2115_v55, %v684_v60  ;;  %v705_v60 = vmax.f32 %v650_v33, 0.0 }
 0x2a5   :  { %v734_v3 = vpack.c.bf16 %v716_v0, %v715_v54 }
 0x2a6   :  { %v719_v19 = vmax.f32 %v685_v23, 0.0  ;;  %v729_v23 = vpack.c.bf16 %v706_v40, %v705_v60 }
 0x2ab   :  { %v686_v6 = vpop.f32.mrf.mxu3 }
 0x2ac   :  { %v687_v21 = vadd.f32 %v2115_v55, %v686_v6 }
 0x2ae   :  { %v720_v36 = vmax.f32 %v687_v21, 0.0 }
 0x2b0   :  { %v736_v51 = vpack.c.bf16 %v720_v36, %v719_v19  ;;  %v2503_v36 = vld [vmem:[#allocation9_spill] sm:$0xff] }
 0x2b1   :  { %775 = vmatmul.bf16.gmra.mxu3 %v1996_v22  ;;  %v713_v22 = vmax.f32 %v670_v11, 0.0 }
 0x2b2   :  { %826 = vmatpush.bf16.msrb.mxu2 %v736_v51 }
 0x2b3   :  { %v733_v52 = vpack.c.bf16 %v714_v39, %v713_v22 }
 0x2b6   :  { %827 = vmatpush.bf16.msrb.mxu2 %v735_v32 }
 0x2ba   :  { %828 = vmatpush.bf16.msrb.mxu2 %v734_v3 }
 0x2be   :  { %829 = vmatpush.bf16.msrb.mxu2 %v733_v52 }
 0x2c1   :  { %780 = vmatmul.bf16.gmra.mxu3 %v2006_v42  ;;  %v1599_v42 = vld [vmem:[#allocation2 + $0x38] sm:$0xff] }
 0x2c2   :  { %830 = vmatpush.bf16.msrb.mxu2 %v732_v2  ;;  %999 = vmatpush.bf16.msrb.mxu0 %v1599_v42 }
 0x2c6   :  { %831 = vmatpush.bf16.msrb.mxu2 %v731_v56 }
 0x2ca   :  { %832 = vmatpush.bf16.msrb.mxu2 %v730_v7 }
 0x2ce   :  { %833 = vmatpush.bf16.msrb.mxu2 %v729_v23 }
 0x2d1   :  { %834 = vmatmul.bf16.vlgmr.msrb.gmra.mxu2 %v1940_v16  ;;  %785 = vmatmul.bf16.gmra.mxu3 %v1868_v13  ;;  %v1598_v16 = vld [vmem:[#allocation2 + $0x30] sm:$0xff]  ;;  %v1597_v13 = vld [vmem:[#allocation2 + $0x28] sm:$0xff] }
 0x2d2   :  { %1000 = vmatpush.bf16.msrb.mxu0 %v1598_v16 }
 0x2d6   :  { %1001 = vmatpush.bf16.msrb.mxu0 %v1597_v13 }
 0x2e1   :  { %839 = vmatmul.bf16.gmra.mxu2 %v1950_v31  ;;  %790 = vmatmul.bf16.gmra.mxu3 %v1871_v18  ;;  %v1596_v31 = vld [vmem:[#allocation2 + $0x20] sm:$0xff]  ;;  %v746_v18 = vpop.f32.mrf.mxu3 }
 0x2e2   :  { %1002 = vmatpush.bf16.msrb.mxu0 %v1596_v31 }
 0x2f1   :  { %844 = vmatmul.bf16.gmra.mxu2 %v1966_v47  ;;  %795 = vmatmul.bf16.gmra.mxu3 %v1877_v24  ;;  %v1595_v47 = vld [vmem:[#allocation2 + $0x18] sm:$0xff]  ;;  %v1594_v24 = vld [vmem:[#allocation2 + $0x10] sm:$0xff] }
 0x2f2   :  { %1003 = vmatpush.bf16.msrb.mxu0 %v1595_v47 }
 0x2f6   :  { %1004 = vmatpush.bf16.msrb.mxu0 %v1594_v24 }
 0x301   :  { %849 = vmatmul.bf16.gmra.mxu2 %v1976_v61  ;;  %800 = vmatmul.bf16.gmra.mxu3 %v1880_v29  ;;  %v748_v61 = vpop.f32.mrf.mxu3  ;;  %v1593_v29 = vld [vmem:[#allocation2 + $0x8] sm:$0xff] }
 0x302   :  { %1005 = vmatpush.bf16.msrb.mxu0 %v1593_v29 }
 0x311   :  { %854 = vmatmul.bf16.gmra.mxu2 %v1992_v14  ;;  %805 = vmatmul.bf16.gmra.mxu3 %v1886_v35  ;;  %v1592_v14 = vld [vmem:[#allocation2] sm:$0xff] }
 0x312   :  { %1006 = vmatpush.bf16.msrb.mxu0 %v1592_v14 }
 0x321   :  { %859 = vmatmul.bf16.gmra.mxu2 %v2002_v37  ;;  %v751_v37 = vpop.f32.mrf.mxu3 }
 0x329   :  { %v753_v55 = vpop.f32.mrf.mxu3  ;;  %810 = vmatmul.bf16.gmra.mxu3 %v1901_v44 }
 0x331   :  { %864 = vmatmul.bf16.gmra.mxu2 %v2015_v53  ;;  %v756_v49 = vpop.f32.mrf.mxu3 }
 0x339   :  { %v758_v6 = vpop.f32.mrf.mxu3  ;;  %815 = vmatmul.bf16.gmra.mxu3 %v1922_v57 }
 0x341   :  { %869 = vmatmul.bf16.gmra.mxu2 %v2025_v8  ;;  %v761_v35 = vpop.f32.mrf.mxu3 }
 0x349   :  { %v763_v8 = vpop.f32.mrf.mxu3  ;;  %820 = vmatmul.bf16.gmra.mxu3 %v2504_v10 }
 0x351   :  { %874 = vmatmul.bf16.gmra.mxu2 %v2035_v30  ;;  %v766_v51 = vpop.f32.mrf.mxu3 }
 0x354   :  { %v835_v53 = vpop.f32.mrf.mxu2 }
 0x355   :  { %v836_v21 = vadd.f32 %v835_v53, %v746_v18 }
 0x359   :  { %v768_v12 = vpop.f32.mrf.mxu3 }
 0x35c   :  { %v837_v26 = vpop.f32.mrf.mxu2 }
 0x35d   :  { %v838_v41 = vadd.f32 %v837_v26, %v748_v61 }
 0x35f   :  { %v915_v19 = vpack.c.bf16 %v838_v41, %v836_v21 }
 0x361   :  { %879 = vmatmul.bf16.gmra.mxu2 %v2503_v36  ;;  %1007 = vmatmul.bf16.vlgmr.msrb.gmra.mxu0 %v915_v19  ;;  %v771_v32 = vpop.f32.mrf.mxu3 }
 0x364   :  { %v840_v48 = vpop.f32.mrf.mxu2 }
 0x365   :  { %v841_v1 = vadd.f32 %v840_v48, %v751_v37 }
 0x369   :  { %v773_v3 = vpop.f32.mrf.mxu3 }
 0x36c   :  { %v842_v44 = vpop.f32.mrf.mxu2 }
 0x36d   :  { %v843_v30 = vadd.f32 %v842_v44, %v753_v55  ;;  %v2193_v55 = vld [vmem:[%s2491_s5] ss:$0 sm:$0xff]  ;;  %s1800_s5 = smov [#allocation5]  }
 0x36e   :  { %s1444_s19 = sshll.u32 %s1800_s5, 4  ;;  %s1445_s19 = int_to_ptr.vmem [resolvable:$true] %s1444_s19 }
 0x36f   :  { %v916_v15 = vpack.c.bf16 %v843_v30, %v841_v1 }
 0x371   :  { %884 = vmatmul.bf16.gmra.mxu2 %v2046_v38  ;;  %1012 = vmatmul.bf16.gmra.mxu0 %v916_v15  ;;  %v776_v34 = vpop.f32.mrf.mxu3 }
 0x374   :  { %v845_v57 = vpop.f32.mrf.mxu2 }
 0x375   :  { %v846_v11 = vadd.f32 %v845_v57, %v756_v49 }
 0x379   :  { %v778_v17 = vpop.f32.mrf.mxu3 }
 0x37c   :  { %v847_v0 = vpop.f32.mrf.mxu2 }
 0x37d   :  { %v848_v54 = vadd.f32 %v847_v0, %v758_v6 }
 0x37f   :  { %v917_v62 = vpack.c.bf16 %v848_v54, %v846_v11 }
 0x381   :  { %889 = vmatmul.bf16.gmra.mxu2 %v2505_v50  ;;  %1017 = vmatmul.bf16.gmra.mxu0 %v917_v62  ;;  %v781_v25 = vpop.f32.mrf.mxu3 }
 0x384   :  { %v850_v39 = vpop.f32.mrf.mxu2 }
 0x385   :  { %v851_v22 = vadd.f32 %v850_v39, %v761_v35 }
 0x389   :  { %v783_v56 = vpop.f32.mrf.mxu3 }
 0x38c   :  { %v852_v59 = vpop.f32.mrf.mxu2 }
 0x38d   :  { %v853_v9 = vadd.f32 %v852_v59, %v763_v8 }
 0x38f   :  { %v918_v52 = vpack.c.bf16 %v853_v9, %v851_v22 }
 0x391   :  { %894 = vmatmul.bf16.gmra.mxu2 %v2506_v46  ;;  %1022 = vmatmul.bf16.gmra.mxu0 %v918_v52  ;;  %v786_v60 = vpop.f32.mrf.mxu3 }
 0x394   :  { %v855_v38 = vpop.f32.mrf.mxu2 }
 0x395   :  { %v856_v20 = vadd.f32 %v855_v38, %v766_v51 }
 0x399   :  { %v788_v31 = vpop.f32.mrf.mxu3 }
 0x39c   :  { %v857_v28 = vpop.f32.mrf.mxu2 }
 0x39d   :  { %v858_v2 = vadd.f32 %v857_v28, %v768_v12 }
 0x39f   :  { %v919_v43 = vpack.c.bf16 %v858_v2, %v856_v20 }
 0x3a1   :  { %899 = vmatmul.bf16.gmra.mxu2 %v2507_v58  ;;  %1027 = vmatmul.bf16.gmra.mxu0 %v919_v43  ;;  %v791_v47 = vpop.f32.mrf.mxu3 }
 0x3a4   :  { %v860_v45 = vpop.f32.mrf.mxu2 }
 0x3a5   :  { %v861_v33 = vadd.f32 %v860_v45, %v771_v32 }
 0x3ac   :  { %v862_v27 = vpop.f32.mrf.mxu2 }
 0x3ad   :  { %v863_v4 = vadd.f32 %v862_v27, %v773_v3 }
 0x3af   :  { %v920_v40 = vpack.c.bf16 %v863_v4, %v861_v33 }
 0x3b1   :  { %904 = vmatmul.bf16.gmra.mxu2 %v2068_v63  ;;  %1032 = vmatmul.bf16.gmra.mxu0 %v920_v40  ;;  %v793_v63 = vpop.f32.mrf.mxu3 }
 0x3b4   :  { %v865_v7 = vpop.f32.mrf.mxu2 }
 0x3b5   :  { %v866_v42 = vadd.f32 %v865_v7, %v776_v34 }
 0x3bc   :  { %v867_v23 = vpop.f32.mrf.mxu2 }
 0x3bd   :  { %v868_v16 = vadd.f32 %v867_v23, %v778_v17 }
 0x3bf   :  { %v921_v13 = vpack.c.bf16 %v868_v16, %v866_v42 }
 0x3c1   :  { %909 = vmatmul.bf16.gmra.mxu2 %v2072_v5  ;;  %1037 = vmatmul.bf16.gmra.mxu0 %v921_v13  ;;  %v796_v5 = vpop.f32.mrf.mxu3 }
 0x3c4   :  { %v870_v18 = vpop.f32.mrf.mxu2 }
 0x3c5   :  { %v871_v61 = vadd.f32 %v870_v18, %v781_v25 }
 0x3c9   :  { %v798_v48 = vpop.f32.mrf.mxu3 }
 0x3cc   :  { %v872_v24 = vpop.f32.mrf.mxu2 }
 0x3cd   :  { %v873_v29 = vadd.f32 %v872_v24, %v783_v56 }
 0x3cf   :  { %v922_v14 = vpack.c.bf16 %v873_v29, %v871_v61 }
 0x3d1   :  { %1042 = vmatmul.bf16.gmra.mxu0 %v922_v14  ;;  %v801_v15 = vpop.f32.mrf.mxu3 }
 0x3d4   :  { %v875_v37 = vpop.f32.mrf.mxu2 }
 0x3d5   :  { %v876_v53 = vadd.f32 %v875_v37, %v786_v60 }
 0x3d9   :  { %v803_v11 = vpop.f32.mrf.mxu3 }
 0x3dc   :  { %v877_v49 = vpop.f32.mrf.mxu2 }
 0x3dd   :  { %v878_v6 = vadd.f32 %v877_v49, %v788_v31 }
 0x3de   :  { %v1008_v26 = vpop.f32.mrf.mxu0 }
 0x3df   :  { %v923_v35 = vpack.c.bf16 %v878_v6, %v876_v53  ;;  %v2196_v21 = vadd.f32 %v2193_v55, %v1008_v26 }
 0x3e1   :  { %1088 = vmax.xlane.f32.xlu0 %v2196_v21  ;;  %1047 = vmatmul.bf16.gmra.mxu0 %v923_v35  ;;  %v806_v9 = vpop.f32.mrf.mxu3 }
 0x3e4   :  { %v880_v41 = vpop.f32.mrf.mxu2 }
 0x3e5   :  { %v881_v10 = vadd.f32 %v880_v41, %v791_v47 }
 0x3e6   :  { %v1010_v19 = vpop.f32.mrf.mxu0 }
 0x3e7   :  { %v2200_v36 = vadd.f32 %v2193_v55, %v1010_v19 }
 0x3e9   :  { %1090 = vmax.xlane.f32.xlu0 %v2200_v36  ;;  %v808_v2 = vpop.f32.mrf.mxu3 }
 0x3ec   :  { %v882_v8 = vpop.f32.mrf.mxu2 }
 0x3ed   :  { %v883_v44 = vadd.f32 %v882_v8, %v793_v63 }
 0x3ee   :  { %v1013_v51 = vpop.f32.mrf.mxu0 }
 0x3ef   :  { %v924_v1 = vpack.c.bf16 %v883_v44, %v881_v10  ;;  %v2204_v30 = vadd.f32 %v2193_v55, %v1013_v51 }
 0x3f1   :  { %1092 = vmax.xlane.f32.xlu1 %v2204_v30  ;;  %1052 = vmatmul.bf16.gmra.mxu0 %v924_v1  ;;  %v811_v45 = vpop.f32.mrf.mxu3 }
 0x3f4   :  { %v885_v57 = vpop.f32.mrf.mxu2 }
 0x3f5   :  { %v886_v54 = vadd.f32 %v885_v57, %v796_v5 }
 0x3f6   :  { %v1015_v12 = vpop.f32.mrf.mxu0 }
 0x3f7   :  { %v2208_v0 = vadd.f32 %v2193_v55, %v1015_v12 }
 0x3f9   :  { %1094 = vmax.xlane.f32.xlu1 %v2208_v0  ;;  %v813_v23 = vpop.f32.mrf.mxu3 }
 0x3fc   :  { %v887_v32 = vpop.f32.mrf.mxu2 }
 0x3fd   :  { %v888_v62 = vadd.f32 %v887_v32, %v798_v48 }
 0x3fe   :  { %v1018_v50 = vpop.f32.mrf.mxu0 }
 0x3ff   :  { %v925_v39 = vpack.c.bf16 %v888_v62, %v886_v54  ;;  %v2212_v3 = vadd.f32 %v2193_v55, %v1018_v50 }
 0x401   :  { %1096 = vmax.xlane.f32.xlu2 %v2212_v3  ;;  %1057 = vmatmul.bf16.gmra.mxu0 %v925_v39  ;;  %v816_v24 = vpop.f32.mrf.mxu3 }
 0x404   :  { %v890_v59 = vpop.f32.mrf.mxu2 }
 0x405   :  { %v891_v46 = vadd.f32 %v890_v59, %v801_v15 }
 0x406   :  { %v1020_v22 = vpop.f32.mrf.mxu0 }
 0x407   :  { %v2216_v34 = vadd.f32 %v2193_v55, %v1020_v22 }
 0x409   :  { %1098 = vmax.xlane.f32.xlu2 %v2216_v34  ;;  %v818_v49 = vpop.f32.mrf.mxu3 }
 0x40c   :  { %v892_v52 = vpop.f32.mrf.mxu2 }
 0x40d   :  { %v893_v38 = vadd.f32 %v892_v52, %v803_v11 }
 0x40e   :  { %v1023_v17 = vpop.f32.mrf.mxu0 }
 0x40f   :  { %v926_v28 = vpack.c.bf16 %v893_v38, %v891_v46  ;;  %v2220_v20 = vadd.f32 %v2193_v55, %v1023_v17 }
 0x411   :  { %1100 = vmax.xlane.f32.xlu0 %v2220_v20  ;;  %1062 = vmatmul.bf16.gmra.mxu0 %v926_v28  ;;  %v821_v19 = vpop.f32.mrf.mxu3 }
 0x414   :  { %v895_v43 = vpop.f32.mrf.mxu2 }
 0x415   :  { %v896_v56 = vadd.f32 %v895_v43, %v806_v9 }
 0x416   :  { %v1025_v58 = vpop.f32.mrf.mxu0 }
 0x417   :  { %v2224_v25 = vadd.f32 %v2193_v55, %v1025_v58 }
 0x419   :  { %1102 = vmax.xlane.f32.xlu1 %v2224_v25  ;;  %v823_v44 = vpop.f32.mrf.mxu3 }
 0x41c   :  { %v897_v27 = vpop.f32.mrf.mxu2 }
 0x41d   :  { %v898_v33 = vadd.f32 %v897_v27, %v808_v2 }
 0x41e   :  { %v1028_v4 = vpop.f32.mrf.mxu0 }
 0x41f   :  { %v927_v40 = vpack.c.bf16 %v898_v33, %v896_v56  ;;  %v2228_v7 = vadd.f32 %v2193_v55, %v1028_v4 }
 0x421   :  { %1104 = vmax.xlane.f32.xlu2 %v2228_v7  ;;  %1067 = vmatmul.bf16.gmra.mxu0 %v927_v40 }
 0x424   :  { %v900_v60 = vpop.f32.mrf.mxu2 }
 0x425   :  { %v901_v31 = vadd.f32 %v900_v60, %v811_v45 }
 0x426   :  { %v1030_v42 = vpop.f32.mrf.mxu0 }
 0x427   :  { %v2232_v16 = vadd.f32 %v2193_v55, %v1030_v42 }
 0x429   :  { %1106 = vmax.xlane.f32.xlu0 %v2232_v16 }
 0x42c   :  { %v902_v13 = vpop.f32.mrf.mxu2 }
 0x42d   :  { %v903_v18 = vadd.f32 %v902_v13, %v813_v23 }
 0x42e   :  { %v1033_v47 = vpop.f32.mrf.mxu0 }
 0x42f   :  { %v928_v61 = vpack.c.bf16 %v903_v18, %v901_v31  ;;  %v2236_v29 = vadd.f32 %v2193_v55, %v1033_v47 }
 0x431   :  { %1108 = vmax.xlane.f32.xlu1 %v2236_v29  ;;  %1072 = vmatmul.bf16.gmra.mxu0 %v928_v61 }
 0x434   :  { %v905_v14 = vpop.f32.mrf.mxu2 }
 0x435   :  { %v906_v6 = vadd.f32 %v905_v14, %v816_v24 }
 0x436   :  { %v1035_v37 = vpop.f32.mrf.mxu0 }
 0x437   :  { %v2240_v63 = vadd.f32 %v2193_v55, %v1035_v37 }
 0x439   :  { %1110 = vmax.xlane.f32.xlu2 %v2240_v63 }
 0x43c   :  { %v907_v53 = vpop.f32.mrf.mxu2 }
 0x43d   :  { %v908_v26 = vadd.f32 %v907_v53, %v818_v49 }
 0x43e   :  { %v1038_v5 = vpop.f32.mrf.mxu0 }
 0x43f   :  { %v929_v35 = vpack.c.bf16 %v908_v26, %v906_v6  ;;  %v2244_v41 = vadd.f32 %v2193_v55, %v1038_v5 }
 0x441   :  { %1112 = vmax.xlane.f32.xlu0 %v2244_v41  ;;  %1077 = vmatmul.bf16.gmra.mxu0 %v929_v35 }
 0x444   :  { %v910_v48 = vpop.f32.mrf.mxu2 }
 0x445   :  { %v911_v1 = vadd.f32 %v910_v48, %v821_v19 }
 0x446   :  { %v1040_v8 = vpop.f32.mrf.mxu0 }
 0x447   :  { %v2248_v10 = vadd.f32 %v2193_v55, %v1040_v8 }
 0x449   :  { %1114 = vmax.xlane.f32.xlu1 %v2248_v10 }
 0x44c   :  { %v912_v51 = vpop.f32.mrf.mxu2 }
 0x44d   :  { %v913_v15 = vadd.f32 %v912_v51, %v823_v44 }
 0x44e   :  { %v1043_v57 = vpop.f32.mrf.mxu0 }
 0x44f   :  { %v930_v12 = vpack.c.bf16 %v913_v15, %v911_v1  ;;  %v2252_v32 = vadd.f32 %v2193_v55, %v1043_v57 }
 0x451   :  { %1116 = vmax.xlane.f32.xlu2 %v2252_v32  ;;  %1082 = vmatmul.bf16.gmra.mxu0 %v930_v12 }
 0x454   :  { %v1089_v11 = vpop.xlane.xlu0 %1088 }
 0x455   :  { %v2256_v54 = vsub.f32 %v2196_v21, %v1089_v11 }
 0x456   :  { %v1045_v62 = vpop.f32.mrf.mxu0 }
 0x457   :  { %v1184_v50 = vmul.f32 1.442695, %v2256_v54  ;;  %v2260_v39 = vadd.f32 %v2193_v55, %v1045_v62 }
 0x459   :  { %1617 = vpow2.f32 %v1184_v50  ;;  %1118 = vmax.xlane.f32.xlu0 %v2260_v39 }
 0x45c   :  { %v1091_v59 = vpop.xlane.xlu0 %1090 }
 0x45d   :  { %v2264_v22 = vsub.f32 %v2200_v36, %v1091_v59 }
 0x45e   :  { %v1048_v9 = vpop.f32.mrf.mxu0 }
 0x45f   :  { %v1618_v52 = vpop.eup %1617  ;;  %v1186_v46 = vmul.f32 1.442695, %v2264_v22  ;;  %v2268_v21 = vadd.f32 %v2193_v55, %v1048_v9 }
 0x460   :  { %1248 = vadd.xlane.f32.xlu2 %v1618_v52 }
 0x461   :  { %1619 = vpow2.f32 %v1186_v46  ;;  %1120 = vmax.xlane.f32.xlu1 %v2268_v21 }
 0x464   :  { %v1093_v38 = vpop.xlane.xlu1 %1092 }
 0x465   :  { %v2272_v17 = vsub.f32 %v2204_v30, %v1093_v38 }
 0x466   :  { %v1050_v28 = vpop.f32.mrf.mxu0 }
 0x467   :  { %v1620_v2 = vpop.eup %1619  ;;  %v1188_v36 = vmul.f32 1.442695, %v2272_v17  ;;  %v2276_v43 = vadd.f32 %v2193_v55, %v1050_v28 }
 0x468   :  { %1250 = vadd.xlane.f32.xlu0 %v1620_v2 }
 0x469   :  { %1621 = vpow2.f32 %v1188_v36  ;;  %1122 = vmax.xlane.f32.xlu2 %v2276_v43 }
 0x46c   :  { %v1095_v58 = vpop.xlane.xlu1 %1094 }
 0x46d   :  { %v2280_v45 = vsub.f32 %v2208_v0, %v1095_v58 }
 0x46e   :  { %v1053_v27 = vpop.f32.mrf.mxu0 }
 0x46f   :  { %v1622_v56 = vpop.eup %1621  ;;  %v1190_v30 = vmul.f32 1.442695, %v2280_v45  ;;  %v2284_v33 = vadd.f32 %v2193_v55, %v1053_v27 }
 0x470   :  { %1252 = vadd.xlane.f32.xlu1 %v1622_v56 }
 0x471   :  { %1623 = vpow2.f32 %v1190_v30  ;;  %1124 = vmax.xlane.f32.xlu0 %v2284_v33 }
 0x474   :  { %v1097_v4 = vpop.xlane.xlu2 %1096 }
 0x475   :  { %v2288_v40 = vsub.f32 %v2212_v3, %v1097_v4 }
 0x476   :  { %v1055_v60 = vpop.f32.mrf.mxu0 }
 0x477   :  { %v1624_v23 = vpop.eup %1623  ;;  %v1192_v0 = vmul.f32 1.442695, %v2288_v40  ;;  %v2292_v42 = vadd.f32 %v2193_v55, %v1055_v60 }
 0x478   :  { %1254 = vadd.xlane.f32.xlu2 %v1624_v23 }
 0x479   :  { %1625 = vpow2.f32 %v1192_v0  ;;  %1126 = vmax.xlane.f32.xlu1 %v2292_v42 }
 0x47c   :  { %v1099_v13 = vpop.xlane.xlu2 %1098 }
 0x47d   :  { %v2296_v31 = vsub.f32 %v2216_v34, %v1099_v13 }
 0x47e   :  { %v1058_v18 = vpop.f32.mrf.mxu0 }
 0x47f   :  { %v1626_v47 = vpop.eup %1625  ;;  %v1194_v3 = vmul.f32 1.442695, %v2296_v31  ;;  %v2300_v24 = vadd.f32 %v2193_v55, %v1058_v18 }
 0x480   :  { %1256 = vadd.xlane.f32.xlu0 %v1626_v47 }
 0x481   :  { %1627 = vpow2.f32 %v1194_v3  ;;  %1128 = vmax.xlane.f32.xlu2 %v2300_v24 }
 0x484   :  { %v1101_v61 = vpop.xlane.xlu0 %1100 }
 0x485   :  { %v2304_v14 = vsub.f32 %v2220_v20, %v1101_v61 }
 0x486   :  { %v1060_v37 = vpop.f32.mrf.mxu0 }
 0x487   :  { %v1628_v49 = vpop.eup %1627  ;;  %v1196_v34 = vmul.f32 1.442695, %v2304_v14  ;;  %v2308_v53 = vadd.f32 %v2193_v55, %v1060_v37 }
 0x488   :  { %1258 = vadd.xlane.f32.xlu1 %v1628_v49 }
 0x489   :  { %1629 = vpow2.f32 %v1196_v34  ;;  %1130 = vmax.xlane.f32.xlu0 %v2308_v53 }
 0x48c   :  { %v1103_v6 = vpop.xlane.xlu1 %1102 }
 0x48d   :  { %v2312_v26 = vsub.f32 %v2224_v25, %v1103_v6 }
 0x48e   :  { %v1063_v5 = vpop.f32.mrf.mxu0 }
 0x48f   :  { %v1630_v35 = vpop.eup %1629  ;;  %v1198_v20 = vmul.f32 1.442695, %v2312_v26  ;;  %v2316_v19 = vadd.f32 %v2193_v55, %v1063_v5 }
 0x490   :  { %1260 = vadd.xlane.f32.xlu2 %v1630_v35 }
 0x491   :  { %1631 = vpow2.f32 %v1198_v20  ;;  %1132 = vmax.xlane.f32.xlu1 %v2316_v19 }
 0x494   :  { %v1105_v48 = vpop.xlane.xlu2 %1104 }
 0x495   :  { %v2320_v8 = vsub.f32 %v2228_v7, %v1105_v48 }
 0x496   :  { %v1065_v44 = vpop.f32.mrf.mxu0 }
 0x497   :  { %v1632_v51 = vpop.eup %1631  ;;  %v1200_v25 = vmul.f32 1.442695, %v2320_v8  ;;  %v2324_v1 = vadd.f32 %v2193_v55, %v1065_v44 }
 0x498   :  { %1262 = vadd.xlane.f32.xlu0 %v1632_v51 }
 0x499   :  { %1633 = vpow2.f32 %v1200_v25  ;;  %1134 = vmax.xlane.f32.xlu2 %v2324_v1 }
 0x49c   :  { %v1107_v15 = vpop.xlane.xlu0 %1106 }
 0x49d   :  { %v2328_v57 = vsub.f32 %v2232_v16, %v1107_v15 }
 0x49e   :  { %v1068_v12 = vpop.f32.mrf.mxu0 }
 0x49f   :  { %v1634_v11 = vpop.eup %1633  ;;  %v1202_v7 = vmul.f32 1.442695, %v2328_v57  ;;  %v2332_v62 = vadd.f32 %v2193_v55, %v1068_v12 }
 0x4a0   :  { %1264 = vadd.xlane.f32.xlu1 %v1634_v11 }
 0x4a1   :  { %1635 = vpow2.f32 %v1202_v7  ;;  %1136 = vmax.xlane.f32.xlu0 %v2332_v62 }
 0x4a4   :  { %v1109_v50 = vpop.xlane.xlu1 %1108 }
 0x4a5   :  { %v2336_v59 = vsub.f32 %v2236_v29, %v1109_v50 }
 0x4a6   :  { %v1070_v9 = vpop.f32.mrf.mxu0 }
 0x4a7   :  { %v1636_v52 = vpop.eup %1635  ;;  %v1204_v16 = vmul.f32 1.442695, %v2336_v59  ;;  %v2340_v46 = vadd.f32 %v2193_v55, %v1070_v9 }
 0x4a8   :  { %1266 = vadd.xlane.f32.xlu2 %v1636_v52 }
 0x4a9   :  { %1637 = vpow2.f32 %v1204_v16  ;;  %1138 = vmax.xlane.f32.xlu1 %v2340_v46 }
 0x4ac   :  { %v1111_v4 = vpop.xlane.xlu2 %1110 }
 0x4ae   :  { %v1073_v38 = vpop.f32.mrf.mxu0 }
 0x4af   :  { %v1638_v28 = vpop.eup %1637  ;;  %v2344_v2 = vadd.f32 %v2193_v55, %v1073_v38 }
 0x4b0   :  { %1268 = vadd.xlane.f32.xlu0 %v1638_v28 }
 0x4b1   :  { %1140 = vmax.xlane.f32.xlu2 %v2344_v2 }
 0x4b4   :  { %v1113_v27 = vpop.xlane.xlu0 %1112 }
 0x4b5   :  { %v2356_v30 = vsub.f32 %v2244_v41, %v1113_v27 }
 0x4b6   :  { %v1075_v29 = vpop.f32.mrf.mxu0 }
 0x4b7   :  { %v2348_v36 = vadd.f32 %v2193_v55, %v1075_v29  ;;  %v1208_v60 = vmul.f32 1.442695, %v2356_v30 }
 0x4b9   :  { %1142 = vmax.xlane.f32.xlu0 %v2348_v36  ;;  %1639 = vpow2.f32 %v1208_v60 }
 0x4bc   :  { %v1115_v13 = vpop.xlane.xlu1 %1114 }
 0x4bd   :  { %v2364_v18 = vsub.f32 %v2248_v10, %v1115_v13  ;;  %v2376_v10 = vsub.f32 %v2240_v63, %v1111_v4 }
 0x4be   :  { %v1078_v58 = vpop.f32.mrf.mxu0 }
 0x4bf   :  { %v2352_v56 = vadd.f32 %v2193_v55, %v1078_v58  ;;  %v1210_v37 = vmul.f32 1.442695, %v2364_v18  ;;  %v1640_v6 = vpop.eup %1639  ;;  %v1206_v20 = vmul.f32 1.442695, %v2376_v10 }
 0x4c1   :  { %1144 = vmax.xlane.f32.xlu1 %v2352_v56 }
 0x4c4   :  { %v1117_v47 = vpop.xlane.xlu2 %1116 }
 0x4c5   :  { %v2388_v12 = vsub.f32 %v2252_v32, %v1117_v47 }
 0x4c6   :  { %v1080_v23 = vpop.f32.mrf.mxu0 }
 0x4c7   :  { %v2360_v0 = vadd.f32 %v2193_v55, %v1080_v23  ;;  %v1212_v50 = vmul.f32 1.442695, %v2388_v12 }
 0x4c9   :  { %1146 = vmax.xlane.f32.xlu2 %v2360_v0 }
 0x4cc   :  { %v1119_v3 = vpop.xlane.xlu0 %1118 }
 0x4cd   :  { %v2367_v61 = vsub.f32 %v2260_v39, %v1119_v3 }
 0x4ce   :  { %v1083_v41 = vpop.f32.mrf.mxu0 }
 0x4cf   :  { %v1214_v49 = vmul.f32 1.442695, %v2367_v61  ;;  %v2372_v34 = vadd.f32 %v2193_v55, %v1083_v41 }
 0x4d1   :  { %1641 = vpow2.f32 %v1214_v49  ;;  %1272 = vadd.xlane.f32.xlu2 %v1640_v6  ;;  %1148 = vmax.xlane.f32.xlu0 %v2372_v34 }
 0x4d2   :  { %1643 = vpow2.f32 %v1210_v37 }
 0x4d3   :  { %v1249_v5 = vpop.xlane.xlu2 %1248 }
 0x4d4   :  { %1645 = vlog2.f32 %v1249_v5  ;;  %v1121_v39 = vpop.xlane.xlu1 %1120 }
 0x4d5   :  { %v2379_v35 = vsub.f32 %v2268_v21, %v1121_v39 }
 0x4d6   :  { %v1085_v48 = vpop.f32.mrf.mxu0 }
 0x4d7   :  { %v1642_v44 = vpop.eup %1641  ;;  %v1216_v51 = vmul.f32 1.442695, %v2379_v35  ;;  %v2384_v25 = vadd.f32 %v2193_v55, %v1085_v48 }
 0x4d8   :  { %v1644_v15 = vpop.eup %1643 }
 0x4d9   :  { %1647 = vpow2.f32 %v1216_v51  ;;  %1278 = vadd.xlane.f32.xlu2 %v1642_v44  ;;  %1150 = vmax.xlane.f32.xlu1 %v2384_v25 }
 0x4da   :  { %v1646_v63 = vpop.eup %1645  ;;  %1649 = vpow2.f32 %v1206_v20  ;;  %1274 = vadd.xlane.f32.xlu0 %v1644_v15 }
 0x4db   :  { %v1313_v21 = vmul.f32 0.6931472, %v1646_v63  ;;  %v1251_v11 = vpop.xlane.xlu0 %1250 }
 0x4dc   :  { %1651 = vlog2.f32 %v1251_v11  ;;  %v1123_v9 = vpop.xlane.xlu2 %1122 }
 0x4dd   :  { %v1376_v7 = vsub.f32 %v2256_v54, %v1313_v21  ;;  %1653 = vpow2.f32 %v1212_v50  ;;  %v2393_v38 = vsub.f32 %v2276_v43, %v1123_v9 }
 0x4df   :  { %v1648_v55 = vpop.eup %1647  ;;  %1408 = vst [vmem:[#allocation5] sm:$0xff] %v1376_v7  ;;  %v1218_v27 = vmul.f32 1.442695, %v2393_v38 }
 0x4e0   :  { %v1650_v52 = vpop.eup %1649 }
 0x4e1   :  { %1270 = vadd.xlane.f32.xlu1 %v1650_v52 }
 0x4e2   :  { %v1652_v16 = vpop.eup %1651  ;;  %1280 = vadd.xlane.f32.xlu0 %v1648_v55 }
 0x4e3   :  { %v1315_v32 = vmul.f32 0.6931472, %v1652_v16  ;;  %v1253_v28 = vpop.xlane.xlu1 %1252  ;;  %v1654_v60 = vpop.eup %1653 }
 0x4e4   :  { %1655 = vlog2.f32 %v1253_v28  ;;  %v1125_v29 = vpop.xlane.xlu0 %1124 }
 0x4e5   :  { %v1377_v58 = vsub.f32 %v2264_v22, %v1315_v32  ;;  %v2397_v54 = vsub.f32 %v2284_v33, %v1125_v29 }
 0x4e7   :  { %1409 = vst [vmem:[#allocation5 + $0x8] sm:$0xff] %v1377_v58  ;;  %v1220_v4 = vmul.f32 1.442695, %v2397_v54 }
 0x4e9   :  { %1657 = vpow2.f32 %v1220_v4  ;;  %1276 = vadd.xlane.f32.xlu1 %v1654_v60 }
 0x4ea   :  { %v1656_v43 = vpop.eup %1655  ;;  %1659 = vpow2.f32 %v1218_v27 }
 0x4eb   :  { %v1317_v23 = vmul.f32 0.6931472, %v1656_v43  ;;  %v1255_v13 = vpop.xlane.xlu2 %1254 }
 0x4ec   :  { %1661 = vlog2.f32 %v1255_v13  ;;  %v1127_v47 = vpop.xlane.xlu1 %1126 }
 0x4ed   :  { %v1378_v3 = vsub.f32 %v2272_v17, %v1317_v23  ;;  %v2403_v22 = vsub.f32 %v2292_v42, %v1127_v47 }
 0x4ef   :  { %v1658_v33 = vpop.eup %1657  ;;  %1410 = vst [vmem:[#allocation5 + $0x10] sm:$0xff] %v1378_v3  ;;  %v1222_v41 = vmul.f32 1.442695, %v2403_v22 }
 0x4f0   :  { %v1660_v37 = vpop.eup %1659  ;;  %1284 = vadd.xlane.f32.xlu2 %v1658_v33 }
 0x4f1   :  { %1663 = vpow2.f32 %v1222_v41  ;;  %1282 = vadd.xlane.f32.xlu1 %v1660_v37 }
 0x4f2   :  { %v1662_v49 = vpop.eup %1661 }
 0x4f3   :  { %v1319_v6 = vmul.f32 0.6931472, %v1662_v49  ;;  %v1257_v5 = vpop.xlane.xlu0 %1256 }
 0x4f4   :  { %1665 = vlog2.f32 %v1257_v5  ;;  %v1129_v39 = vpop.xlane.xlu2 %1128 }
 0x4f5   :  { %v1379_v20 = vsub.f32 %v2280_v45, %v1319_v6  ;;  %v2408_v17 = vsub.f32 %v2300_v24, %v1129_v39 }
 0x4f7   :  { %v1664_v42 = vpop.eup %1663  ;;  %1411 = vst [vmem:[#allocation5 + $0x18] sm:$0xff] %v1379_v20  ;;  %v1224_v48 = vmul.f32 1.442695, %v2408_v17 }
 0x4f8   :  { %1286 = vadd.xlane.f32.xlu0 %v1664_v42 }
 0x4f9   :  { %1667 = vpow2.f32 %v1224_v48 }
 0x4fa   :  { %v1666_v44 = vpop.eup %1665 }
 0x4fb   :  { %v1321_v51 = vmul.f32 0.6931472, %v1666_v44  ;;  %v1259_v15 = vpop.xlane.xlu1 %1258 }
 0x4fc   :  { %1669 = vlog2.f32 %v1259_v15  ;;  %v1131_v63 = vpop.xlane.xlu0 %1130 }
 0x4fd   :  { %v1380_v21 = vsub.f32 %v2288_v40, %v1321_v51  ;;  %v2413_v11 = vsub.f32 %v2308_v53, %v1131_v63 }
 0x4ff   :  { %v1668_v45 = vpop.eup %1667  ;;  %1412 = vst [vmem:[#allocation5 + $0x20] sm:$0xff] %v1380_v21  ;;  %v1226_v24 = vmul.f32 1.442695, %v2413_v11 }
 0x500   :  { %1288 = vadd.xlane.f32.xlu1 %v1668_v45 }
 0x501   :  { %1671 = vpow2.f32 %v1226_v24 }
 0x502   :  { %v1670_v7 = vpop.eup %1669 }
 0x503   :  { %v1323_v50 = vmul.f32 0.6931472, %v1670_v7  ;;  %v1261_v55 = vpop.xlane.xlu2 %1260 }
 0x504   :  { %1673 = vlog2.f32 %v1261_v55  ;;  %v1133_v9 = vpop.xlane.xlu1 %1132 }
 0x505   :  { %v1381_v52 = vsub.f32 %v2296_v31, %v1323_v50  ;;  %v2418_v16 = vsub.f32 %v2316_v19, %v1133_v9 }
 0x507   :  { %v1672_v40 = vpop.eup %1671  ;;  %1413 = vst [vmem:[#allocation5 + $0x28] sm:$0xff] %v1381_v52  ;;  %v1228_v53 = vmul.f32 1.442695, %v2418_v16 }
 0x508   :  { %1290 = vadd.xlane.f32.xlu2 %v1672_v40 }
 0x509   :  { %1675 = vpow2.f32 %v1228_v53 }
 0x50a   :  { %v1674_v32 = vpop.eup %1673 }
 0x50b   :  { %v1325_v28 = vmul.f32 0.6931472, %v1674_v32  ;;  %v1263_v29 = vpop.xlane.xlu0 %1262 }
 0x50c   :  { %1677 = vlog2.f32 %v1263_v29  ;;  %v1135_v58 = vpop.xlane.xlu2 %1134 }
 0x50d   :  { %v1382_v27 = vsub.f32 %v2304_v14, %v1325_v28  ;;  %v2423_v4 = vsub.f32 %v2324_v1, %v1135_v58 }
 0x50f   :  { %v1676_v31 = vpop.eup %1675  ;;  %1414 = vst [vmem:[#allocation5 + $0x30] sm:$0xff] %v1382_v27  ;;  %v1230_v19 = vmul.f32 1.442695, %v2423_v4 }
 0x510   :  { %1292 = vadd.xlane.f32.xlu0 %v1676_v31 }
 0x511   :  { %1679 = vpow2.f32 %v1230_v19 }
 0x512   :  { %v1678_v60 = vpop.eup %1677 }
 0x513   :  { %v1327_v43 = vmul.f32 0.6931472, %v1678_v60  ;;  %v1265_v23 = vpop.xlane.xlu1 %1264 }
 0x514   :  { %1681 = vlog2.f32 %v1265_v23  ;;  %v1137_v13 = vpop.xlane.xlu0 %1136 }
 0x515   :  { %v1383_v47 = vsub.f32 %v2312_v26, %v1327_v43  ;;  %v2428_v3 = vsub.f32 %v2332_v62, %v1137_v13 }
 0x517   :  { %v1680_v14 = vpop.eup %1679  ;;  %1415 = vst [vmem:[#allocation5 + $0x38] sm:$0xff] %v1383_v47  ;;  %v1232_v1 = vmul.f32 1.442695, %v2428_v3 }
 0x518   :  { %1294 = vadd.xlane.f32.xlu1 %v1680_v14 }
 0x519   :  { %1683 = vpow2.f32 %v1232_v1 }
 0x51a   :  { %v1682_v33 = vpop.eup %1681 }
 0x51b   :  { %v1329_v41 = vmul.f32 0.6931472, %v1682_v33  ;;  %v1267_v37 = vpop.xlane.xlu2 %1266 }
 0x51c   :  { %1685 = vlog2.f32 %v1267_v37  ;;  %v1139_v49 = vpop.xlane.xlu1 %1138 }
 0x51d   :  { %v1384_v6 = vsub.f32 %v2320_v8, %v1329_v41  ;;  %v2433_v5 = vsub.f32 %v2340_v46, %v1139_v49 }
 0x51f   :  { %v1684_v26 = vpop.eup %1683  ;;  %1416 = vst [vmem:[#allocation5 + $0x40] sm:$0xff] %v1384_v6  ;;  %v1234_v62 = vmul.f32 1.442695, %v2433_v5 }
 0x520   :  { %1296 = vadd.xlane.f32.xlu2 %v1684_v26 }
 0x521   :  { %1687 = vpow2.f32 %v1234_v62 }
 0x522   :  { %v1686_v39 = vpop.eup %1685 }
 0x523   :  { %v1331_v20 = vmul.f32 0.6931472, %v1686_v39  ;;  %v1269_v42 = vpop.xlane.xlu0 %1268 }
 0x524   :  { %1689 = vlog2.f32 %v1269_v42  ;;  %v1141_v48 = vpop.xlane.xlu2 %1140 }
 0x525   :  { %v1385_v44 = vsub.f32 %v2328_v57, %v1331_v20  ;;  %v2438_v51 = vsub.f32 %v2344_v2, %v1141_v48 }
 0x527   :  { %v1688_v8 = vpop.eup %1687  ;;  %1417 = vst [vmem:[#allocation5 + $0x48] sm:$0xff] %v1385_v44  ;;  %v1236_v46 = vmul.f32 1.442695, %v2438_v51 }
 0x528   :  { %1298 = vadd.xlane.f32.xlu0 %v1688_v8 }
 0x529   :  { %1691 = vpow2.f32 %v1236_v46 }
 0x52a   :  { %v1690_v15 = vpop.eup %1689 }
 0x52b   :  { %v1333_v63 = vmul.f32 0.6931472, %v1690_v15 }
 0x52c   :  { %v1143_v21 = vpop.xlane.xlu0 %1142 }
 0x52d   :  { %v1386_v45 = vsub.f32 %v2336_v59, %v1333_v63  ;;  %v2443_v24 = vsub.f32 %v2348_v36, %v1143_v21 }
 0x52f   :  { %v1692_v7 = vpop.eup %1691  ;;  %1418 = vst [vmem:[#allocation5 + $0x50] sm:$0xff] %v1386_v45  ;;  %v1238_v57 = vmul.f32 1.442695, %v2443_v24 }
 0x530   :  { %1300 = vadd.xlane.f32.xlu1 %v1692_v7 }
 0x531   :  { %1693 = vpow2.f32 %v1238_v57 }
 0x534   :  { %v1145_v2 = vpop.xlane.xlu1 %1144 }
 0x535   :  { %v2447_v50 = vsub.f32 %v2352_v56, %v1145_v2 }
 0x537   :  { %v1694_v55 = vpop.eup %1693  ;;  %v1240_v9 = vmul.f32 1.442695, %v2447_v50 }
 0x538   :  { %1302 = vadd.xlane.f32.xlu2 %v1694_v55 }
 0x539   :  { %1695 = vpow2.f32 %v1240_v9 }
 0x53c   :  { %v1147_v52 = vpop.xlane.xlu2 %1146 }
 0x53d   :  { %v2451_v59 = vsub.f32 %v2360_v0, %v1147_v52 }
 0x53f   :  { %v1696_v36 = vpop.eup %1695  ;;  %v1242_v40 = vmul.f32 1.442695, %v2451_v59 }
 0x540   :  { %1304 = vadd.xlane.f32.xlu0 %v1696_v36 }
 0x541   :  { %1697 = vpow2.f32 %v1242_v40 }
 0x544   :  { %v1273_v53 = vpop.xlane.xlu2 %1272  ;;  %v1149_v32 = vpop.xlane.xlu0 %1148 }
 0x545   :  { %1699 = vlog2.f32 %v1273_v53  ;;  %v2455_v56 = vsub.f32 %v2372_v34, %v1149_v32 }
 0x547   :  { %v1698_v28 = vpop.eup %1697  ;;  %v1244_v29 = vmul.f32 1.442695, %v2455_v56 }
 0x548   :  { %1306 = vadd.xlane.f32.xlu1 %v1698_v28 }
 0x549   :  { %1701 = vpow2.f32 %v1244_v29 }
 0x54b   :  { %v1700_v58 = vpop.eup %1699 }
 0x54c   :  { %v1337_v27 = vmul.f32 0.6931472, %v1700_v58  ;;  %v1279_v0 = vpop.xlane.xlu2 %1278  ;;  %v1151_v31 = vpop.xlane.xlu1 %1150 }
 0x54d   :  { %1703 = vlog2.f32 %v1279_v0  ;;  %v2459_v19 = vsub.f32 %v2384_v25, %v1151_v31  ;;  %v1275_v60 = vpop.xlane.xlu0 %1274 }
 0x54e   :  { %v1388_v43 = vsub.f32 %v2356_v30, %v1337_v27  ;;  %1705 = vlog2.f32 %v1275_v60 }
 0x54f   :  { %v1702_v23 = vpop.eup %1701  ;;  %v1246_v34 = vmul.f32 1.442695, %v2459_v19 }
 0x550   :  { %1420 = vst [vmem:[#allocation5 + $0x60] sm:$0xff] %v1388_v43  ;;  %1308 = vadd.xlane.f32.xlu2 %v1702_v23 }
 0x551   :  { %1707 = vpow2.f32 %v1246_v34 }
 0x553   :  { %v1704_v13 = vpop.eup %1703 }
 0x554   :  { %v1706_v47 = vpop.eup %1705  ;;  %v1343_v14 = vmul.f32 0.6931472, %v1704_v13  ;;  %v1271_v1 = vpop.xlane.xlu1 %1270 }
 0x555   :  { %v1339_v33 = vmul.f32 0.6931472, %v1706_v47  ;;  %1709 = vlog2.f32 %v1271_v1  ;;  %v1281_v41 = vpop.xlane.xlu0 %1280 }
 0x556   :  { %v1391_v25 = vsub.f32 %v2367_v61, %v1343_v14  ;;  %1711 = vlog2.f32 %v1281_v41 }
 0x557   :  { %v1708_v37 = vpop.eup %1707  ;;  %v1389_v30 = vsub.f32 %v2364_v18, %v1339_v33 }
 0x558   :  { %1423 = vst [vmem:[#allocation5 + $0x78] sm:$0xff] %v1391_v25  ;;  %1310 = vadd.xlane.f32.xlu0 %v1708_v37 }
 0x559   :  { %1421 = vst [vmem:[#allocation5 + $0x68] sm:$0xff] %v1389_v30 }
 0x55b   :  { %v1710_v49 = vpop.eup %1709 }
 0x55c   :  { %v1712_v6 = vpop.eup %1711  ;;  %v1335_v26 = vmul.f32 0.6931472, %v1710_v49  ;;  %v1277_v62 = vpop.xlane.xlu1 %1276 }
 0x55d   :  { %v1345_v39 = vmul.f32 0.6931472, %v1712_v6  ;;  %1713 = vlog2.f32 %v1277_v62 }
 0x55e   :  { %v1387_v20 = vsub.f32 %v2376_v10, %v1335_v26 }
 0x55f   :  { %v1392_v42 = vsub.f32 %v2379_v35, %v1345_v39 }
 0x560   :  { %1419 = vst [vmem:[#allocation5 + $0x58] sm:$0xff] %v1387_v20 }
 0x561   :  { %1424 = vst [vmem:[#allocation5 + $0x80] sm:$0xff] %v1392_v42 }
 0x563   :  { %v1714_v61 = vpop.eup %1713  ;;  %v1285_v48 = vpop.xlane.xlu2 %1284 }
 0x564   :  { %v1341_v44 = vmul.f32 0.6931472, %v1714_v61  ;;  %1715 = vlog2.f32 %v1285_v48  ;;  %v1283_v18 = vpop.xlane.xlu1 %1282 }
 0x565   :  { %1717 = vlog2.f32 %v1283_v18 }
 0x566   :  { %v1390_v8 = vsub.f32 %v2388_v12, %v1341_v44 }
 0x568   :  { %1422 = vst [vmem:[#allocation5 + $0x70] sm:$0xff] %v1390_v8 }
 0x56a   :  { %v1716_v46 = vpop.eup %1715 }
 0x56b   :  { %v1718_v15 = vpop.eup %1717  ;;  %v1349_v63 = vmul.f32 0.6931472, %v1716_v46  ;;  %v1287_v21 = vpop.xlane.xlu0 %1286 }
 0x56c   :  { %v1347_v45 = vmul.f32 0.6931472, %v1718_v15  ;;  %1719 = vlog2.f32 %v1287_v21 }
 0x56d   :  { %v1394_v10 = vsub.f32 %v2397_v54, %v1349_v63 }
 0x56e   :  { %v1393_v35 = vsub.f32 %v2393_v38, %v1347_v45 }
 0x56f   :  { %1426 = vst [vmem:[#allocation5 + $0x90] sm:$0xff] %v1394_v10 }
 0x570   :  { %1425 = vst [vmem:[#allocation5 + $0x88] sm:$0xff] %v1393_v35 }
 0x572   :  { %v1720_v7 = vpop.eup %1719 }
 0x573   :  { %v1351_v57 = vmul.f32 0.6931472, %v1720_v7  ;;  %v1289_v2 = vpop.xlane.xlu1 %1288 }
 0x574   :  { %1721 = vlog2.f32 %v1289_v2 }
 0x575   :  { %v1395_v55 = vsub.f32 %v2403_v22, %v1351_v57 }
 0x577   :  { %1427 = vst [vmem:[#allocation5 + $0x98] sm:$0xff] %v1395_v55 }
 0x57a   :  { %v1722_v12 = vpop.eup %1721 }
 0x57b   :  { %v1353_v9 = vmul.f32 0.6931472, %v1722_v12  ;;  %v1291_v52 = vpop.xlane.xlu2 %1290 }
 0x57c   :  { %1723 = vlog2.f32 %v1291_v52 }
 0x57d   :  { %v1396_v36 = vsub.f32 %v2408_v17, %v1353_v9 }
 0x57f   :  { %1428 = vst [vmem:[#allocation5 + $0xa0] sm:$0xff] %v1396_v36 }
 0x582   :  { %v1724_v40 = vpop.eup %1723 }
 0x583   :  { %v1355_v54 = vmul.f32 0.6931472, %v1724_v40  ;;  %v1293_v53 = vpop.xlane.xlu0 %1292 }
 0x584   :  { %1725 = vlog2.f32 %v1293_v53 }
 0x585   :  { %v1397_v38 = vsub.f32 %v2413_v11, %v1355_v54 }
 0x587   :  { %1429 = vst [vmem:[#allocation5 + $0xa8] sm:$0xff] %v1397_v38 }
 0x58a   :  { %v1726_v32 = vpop.eup %1725 }
 0x58b   :  { %v1357_v28 = vmul.f32 0.6931472, %v1726_v32  ;;  %v1295_v29 = vpop.xlane.xlu1 %1294 }
 0x58c   :  { %1727 = vlog2.f32 %v1295_v29 }
 0x58d   :  { %v1398_v22 = vsub.f32 %v2418_v16, %v1357_v28 }
 0x58f   :  { %1430 = vst [vmem:[#allocation5 + $0xb0] sm:$0xff] %v1398_v22 }
 0x592   :  { %v1728_v58 = vpop.eup %1727 }
 0x593   :  { %v1359_v27 = vmul.f32 0.6931472, %v1728_v58  ;;  %v1297_v0 = vpop.xlane.xlu2 %1296 }
 0x594   :  { %1729 = vlog2.f32 %v1297_v0 }
 0x595   :  { %v1399_v17 = vsub.f32 %v2423_v4, %v1359_v27 }
 0x597   :  { %1431 = vst [vmem:[#allocation5 + $0xb8] sm:$0xff] %v1399_v17 }
 0x59a   :  { %v1730_v31 = vpop.eup %1729 }
 0x59b   :  { %v1361_v60 = vmul.f32 0.6931472, %v1730_v31  ;;  %v1299_v43 = vpop.xlane.xlu0 %1298 }
 0x59c   :  { %1731 = vlog2.f32 %v1299_v43 }
 0x59d   :  { %v1400_v11 = vsub.f32 %v2428_v3, %v1361_v60 }
 0x59f   :  { %1432 = vst [vmem:[#allocation5 + $0xc0] sm:$0xff] %v1400_v11 }
 0x5a2   :  { %v1732_v23 = vpop.eup %1731 }
 0x5a3   :  { %v1363_v34 = vmul.f32 0.6931472, %v1732_v23  ;;  %v1301_v13 = vpop.xlane.xlu1 %1300 }
 0x5a4   :  { %1733 = vlog2.f32 %v1301_v13 }
 0x5a5   :  { %v1401_v16 = vsub.f32 %v2433_v5, %v1363_v34 }
 0x5a7   :  { %1433 = vst [vmem:[#allocation5 + $0xc8] sm:$0xff] %v1401_v16 }
 0x5aa   :  { %v1734_v47 = vpop.eup %1733 }
 0x5ab   :  { %v1365_v14 = vmul.f32 0.6931472, %v1734_v47  ;;  %v1303_v1 = vpop.xlane.xlu2 %1302 }
 0x5ac   :  { %1735 = vlog2.f32 %v1303_v1 }
 0x5ad   :  { %v1402_v4 = vsub.f32 %v2438_v51, %v1365_v14 }
 0x5af   :  { %1434 = vst [vmem:[#allocation5 + $0xd0] sm:$0xff] %v1402_v4 }
 0x5b2   :  { %v1736_v33 = vpop.eup %1735 }
 0x5b3   :  { %v1367_v41 = vmul.f32 0.6931472, %v1736_v33  ;;  %v1305_v25 = vpop.xlane.xlu0 %1304 }
 0x5b4   :  { %1737 = vlog2.f32 %v1305_v25 }
 0x5b5   :  { %v1403_v3 = vsub.f32 %v2443_v24, %v1367_v41 }
 0x5b7   :  { %1435 = vst [vmem:[#allocation5 + $0xd8] sm:$0xff] %v1403_v3 }
 0x5ba   :  { %v1738_v37 = vpop.eup %1737 }
 0x5bb   :  { %v1369_v30 = vmul.f32 0.6931472, %v1738_v37  ;;  %v1307_v49 = vpop.xlane.xlu1 %1306 }
 0x5bc   :  { %1739 = vlog2.f32 %v1307_v49 }
 0x5bd   :  { %v1404_v5 = vsub.f32 %v2447_v50, %v1369_v30 }
 0x5bf   :  { %1436 = vst [vmem:[#allocation5 + $0xe0] sm:$0xff] %v1404_v5 }
 0x5c2   :  { %v1740_v6 = vpop.eup %1739 }
 0x5c3   :  { %v1371_v26 = vmul.f32 0.6931472, %v1740_v6  ;;  %v1309_v62 = vpop.xlane.xlu2 %1308 }
 0x5c4   :  { %1741 = vlog2.f32 %v1309_v62 }
 0x5c5   :  { %v1405_v51 = vsub.f32 %v2451_v59, %v1371_v26 }
 0x5c7   :  { %1437 = vst [vmem:[#allocation5 + $0xe8] sm:$0xff] %v1405_v51 }
 0x5ca   :  { %v1742_v39 = vpop.eup %1741 }
 0x5cb   :  { %v1373_v20 = vmul.f32 0.6931472, %v1742_v39  ;;  %v1311_v42 = vpop.xlane.xlu0 %1310 }
 0x5cc   :  { %1743 = vlog2.f32 %v1311_v42 }
 0x5cd   :  { %v1406_v24 = vsub.f32 %v2455_v56, %v1373_v20 }
 0x5cf   :  { %1438 = vst [vmem:[#allocation5 + $0xf0] sm:$0xff] %v1406_v24 }
 0x5d2   :  { %v1744_v50 = vpop.eup %1743 }
 0x5d3   :  { %v1375_v61 = vmul.f32 0.6931472, %v1744_v50 }
 0x5d5   :  { %v1407_v59 = vsub.f32 %v2459_v19, %v1375_v61 }
 0x5d7   :  { %1439 = vst [vmem:[#allocation5 + $0xf8] sm:$0xff] %v1407_v59 }
 0x5d8   :  { %1452 = dma.vmem_to_hbm [thread:$0]  %s1445_s19, 4096, %s1447_s21, [#allocation4], %s1801_s22, %s1801_s22, %s1802_s23  }
 0x5d9   :  { %1795 = dma.done.wait [#allocation4], 4096  }
 0x5da   :  { %1796 = vsyncadd [#allocation4], 4294963200 }
 0x5db   :  { %1457 = vsyncpa [#allocation3], 1 }
 0x5dc   :  { %1458 = vsyncpa [#allocation4], 1 }

</bundles_post_ra>
